<compile_context>
chip_gen: v5e
topology: v5e:2x2
jax: 0.10.0
libtpu: 0.0.40
codegen_flags: <defaults>
</compile_context>

<pallas_src>
import jax
import jax.numpy as jnp
from jax.experimental import pallas as pl
from jax.experimental.pallas import tpu as pltpu

# ---- model hyper-parameters (small, consistent with the module) -------------
LATENT_DIM  = 32        # opt.latent_dim
CHANNELS    = 1         # opt.channels
IMG_SIZE    = 8         # opt.img_size
N_PATHS     = 2         # opt.n_paths_G
H1, H2      = 128, 512  # fixed in the module source
OUT_DIM     = CHANNELS * IMG_SIZE * IMG_SIZE
BN_EPS      = 0.8
LRELU_SLOPE = 0.2


# -----------------------------------------------------------------------------
# Fused kernel: ALL paths in one invocation (no grid).  Default for v5e/v6e.
# Inputs:
#   z    (B, LATENT)
#   w1c  (LATENT, P*H1)      -- per-path first-layer weights concat'd on cols
#   bn1c (3, P*H1)           -- rows = [bias, gamma, beta] of layer-1 BN
#   w2   (P, H1, H2)
#   bn2  (P, 3, H2)          -- [bias, gamma, beta] per path, layer-2 BN
#   w3   (P, H2, OUT_DIM)
#   b3c  (1, P*OUT_DIM)      -- per-path output biases concat'd on cols
# Output:
#   o    (B, P*OUT_DIM)      -- lane-dense (last dim = 128)
# -----------------------------------------------------------------------------
def _generator_fused_kernel(z_ref, w1_ref, bn1_ref, w2_ref, bn2_ref,
                            w3_ref, b3_ref, o_ref):
    z = z_ref[...].astype(jnp.float32)                       # (B, LATENT)
    bn1 = bn1_ref[...]                                       # (3, P*H1)

    # ---- layer 1 (fused across paths): Linear -> BN(eps=0.8) -> LeakyReLU ---
    h = jnp.dot(z, w1_ref[...], preferred_element_type=jnp.float32) + bn1[0:1]
    m = jnp.mean(h, axis=0, keepdims=True)
    v = jnp.mean(jnp.square(h - m), axis=0, keepdims=True)   # biased variance
    scale = bn1[1:2] * jax.lax.rsqrt(v + BN_EPS)              # gamma folded in
    h = (h - m) * scale + bn1[2:3]
    h = jnp.where(h >= 0, h, LRELU_SLOPE * h)                 # (B, P*H1)

    # ---- layers 2 & 3 per path (unrolled: N_PATHS == 2) ----------------------
    outs = []
    for p in range(N_PATHS):
        hp = h[:, p * H1:(p + 1) * H1]                        # 128-aligned slice
        bn2p = bn2_ref[p]                                     # (3, H2)
        g = jnp.dot(hp, w2_ref[p], preferred_element_type=jnp.float32) + bn2p[0:1]
        m2 = jnp.mean(g, axis=0, keepdims=True)
        v2 = jnp.mean(jnp.square(g - m2), axis=0, keepdims=True)
        sc2 = bn2p[1:2] * jax.lax.rsqrt(v2 + BN_EPS)
        g = (g - m2) * sc2 + bn2p[2:3]
        g = jnp.where(g >= 0, g, LRELU_SLOPE * g)             # (B, H2)
        outs.append(jnp.dot(g, w3_ref[p], preferred_element_type=jnp.float32))

    out = jnp.concatenate(outs, axis=-1) + b3_ref[...]        # (B, P*OUT_DIM)
    o_ref[...] = jnp.tanh(out).astype(o_ref.dtype)            # one unmasked store


# -----------------------------------------------------------------------------
# Per-path kernel: grid=(N_PATHS,), "parallel" -> one path per TensorCore.
# Only used on v7x (2 TCs/chip); v5e/v6e have a single TC so the grid is a
# serial loop there and the fused kernel above is used instead.
# -----------------------------------------------------------------------------
def _generator_path_kernel(z_ref, w1_ref, bn1_ref, w2_ref, bn2_ref,
                           w3_ref, b3_ref, o_ref):
    z = z_ref[...].astype(jnp.float32)                        # (B, LATENT)

    bn1 = bn1_ref[0]                                          # (3, H1)
    h = jnp.dot(z, w1_ref[0], preferred_element_type=jnp.float32) + bn1[0:1]
    m = jnp.mean(h, axis=0, keepdims=True)
    v = jnp.mean(jnp.square(h - m), axis=0, keepdims=True)
    h = (h - m) * (bn1[1:2] * jax.lax.rsqrt(v + BN_EPS)) + bn1[2:3]
    h = jnp.where(h >= 0, h, LRELU_SLOPE * h)

    bn2 = bn2_ref[0]                                          # (3, H2)
    h = jnp.dot(h, w2_ref[0], preferred_element_type=jnp.float32) + bn2[0:1]
    m = jnp.mean(h, axis=0, keepdims=True)
    v = jnp.mean(jnp.square(h - m), axis=0, keepdims=True)
    h = (h - m) * (bn2[1:2] * jax.lax.rsqrt(v + BN_EPS)) + bn2[2:3]
    h = jnp.where(h >= 0, h, LRELU_SLOPE * h)

    out = jnp.tanh(jnp.dot(h, w3_ref[0], preferred_element_type=jnp.float32)
                   + b3_ref[0])                               # (B, OUT_DIM)
    o_ref[...] = out[None].astype(o_ref.dtype)


def _use_path_parallel_grid():
    """True only on v7x (2 TensorCores/chip), where sharding the 2 paths
    across cores beats fusing them into one invocation."""
    if N_PATHS < 2:
        return False
    try:
        kind = jax.devices()[0].device_kind.lower()
    except Exception:
        return False
    return ("v7" in kind) or ("tpu7" in kind)


def generator_forward(z, params):
    """z: (B, LATENT_DIM) float32. Returns (N_PATHS*B, C, H, W) float32."""
    B = z.shape[0]
    (w1, b1, g1, be1, w2, b2, g2, be2, w3, b3) = params

    # Pack (bias, gamma, beta) per BN layer -> fewer kernel operands / DMAs.
    bn1 = jnp.concatenate([b1, g1, be1], axis=1)              # (P, 3, H1)
    bn2 = jnp.concatenate([b2, g2, be2], axis=1)              # (P, 3, H2)

    if _use_path_parallel_grid():
        # v7x: keep the path axis as a "parallel" grid dim (one path per TC).
        out = pl.pallas_call(
            _generator_path_kernel,
            out_shape=jax.ShapeDtypeStruct((N_PATHS, B, OUT_DIM), jnp.float32),
            grid_spec=pltpu.PrefetchScalarGridSpec(
                num_scalar_prefetch=0,
                grid=(N_PATHS,),
                in_specs=[
                    pl.BlockSpec((B, LATENT_DIM), lambda p: (0, 0)),       # z shared
                    pl.BlockSpec((1, LATENT_DIM, H1), lambda p: (p, 0, 0)),
                    pl.BlockSpec((1, 3, H1), lambda p: (p, 0, 0)),
                    pl.BlockSpec((1, H1, H2), lambda p: (p, 0, 0)),
                    pl.BlockSpec((1, 3, H2), lambda p: (p, 0, 0)),
                    pl.BlockSpec((1, H2, OUT_DIM), lambda p: (p, 0, 0)),
                    pl.BlockSpec((1, 1, OUT_DIM), lambda p: (p, 0, 0)),
                ],
                out_specs=pl.BlockSpec((1, B, OUT_DIM), lambda p: (p, 0, 0)),
            ),
            compiler_params=pltpu.CompilerParams(
                dimension_semantics=("parallel",)),
        )(z, w1, bn1, w2, bn2, w3, b3)
        return out.reshape(N_PATHS * B, CHANNELS, IMG_SIZE, IMG_SIZE)

    # Default (v5e/v6e): single fused invocation, lane-dense output slab.
    # Layout plumbing (concat of per-path params) done host-side, once.
    w1c  = w1.transpose(1, 0, 2).reshape(LATENT_DIM, N_PATHS * H1)   # (32, 256)
    bn1c = bn1.transpose(1, 0, 2).reshape(3, N_PATHS * H1)           # (3, 256)
    b3c  = b3.transpose(1, 0, 2).reshape(1, N_PATHS * OUT_DIM)       # (1, 128)

    vmem = pl.BlockSpec(memory_space=pltpu.MemorySpace.VMEM)
    out = pl.pallas_call(
        _generator_fused_kernel,
        out_shape=jax.ShapeDtypeStruct((B, N_PATHS * OUT_DIM), jnp.float32),
        in_specs=[vmem] * 7,
        out_specs=vmem,
    )(z, w1c, bn1c, w2, bn2, w3, b3c)

    # (B, P*OUT) -> (P, B, OUT) -> (P*B, C, H, W) == torch.cat(img, dim=0)
    return (out.reshape(B, N_PATHS, OUT_DIM)
               .transpose(1, 0, 2)
               .reshape(N_PATHS * B, CHANNELS, IMG_SIZE, IMG_SIZE))


def init_params(key):
    """Deterministic synthetic parameters, PyTorch-style uniform(+-1/sqrt(fan_in))."""
    ks = jax.random.split(key, 3)

    def lin(k, fan_in, fan_out):
        kw, kb = jax.random.split(k)
        bound = 1.0 / jnp.sqrt(fan_in)
        w = jax.random.uniform(kw, (N_PATHS, fan_in, fan_out), jnp.float32,
                               -bound, bound)
        b = jax.random.uniform(kb, (N_PATHS, 1, fan_out), jnp.float32,
                               -bound, bound)
        return w, b

    w1, b1 = lin(ks[0], LATENT_DIM, H1)
    w2, b2 = lin(ks[1], H1, H2)
    w3, b3 = lin(ks[2], H2, OUT_DIM)
    # BatchNorm1d defaults: weight=1, bias=0 (stored as (P, 1, F))
    g1  = jnp.ones((N_PATHS, 1, H1), jnp.float32)
    be1 = jnp.zeros((N_PATHS, 1, H1), jnp.float32)
    g2  = jnp.ones((N_PATHS, 1, H2), jnp.float32)
    be2 = jnp.zeros((N_PATHS, 1, H2), jnp.float32)
    return (w1, b1, g1, be1, w2, b2, g2, be2, w3, b3)


def reference_forward(z, params):
    """Pure-JAX reference for correctness checking."""
    (w1, b1, g1, be1, w2, b2, g2, be2, w3, b3) = params
    outs = []
    for p in range(N_PATHS):
        h = z @ w1[p] + b1[p]
        m, v = h.mean(0, keepdims=True), h.var(0, keepdims=True)
        h = (h - m) / jnp.sqrt(v + BN_EPS) * g1[p] + be1[p]
        h = jnp.where(h >= 0, h, LRELU_SLOPE * h)
        h = h @ w2[p] + b2[p]
        m, v = h.mean(0, keepdims=True), h.var(0, keepdims=True)
        h = (h - m) / jnp.sqrt(v + BN_EPS) * g2[p] + be2[p]
        h = jnp.where(h >= 0, h, LRELU_SLOPE * h)
        h = jnp.tanh(h @ w3[p] + b3[p])
        outs.append(h.reshape(-1, CHANNELS, IMG_SIZE, IMG_SIZE))
    return jnp.concatenate(outs, axis=0)


if __name__ == "__main__":
    key = jax.random.PRNGKey(0)
    k_z, k_p = jax.random.split(key)

    B = 8
    z = jax.random.normal(k_z, (B, LATENT_DIM), jnp.float32)
    params = init_params(k_p)

    img = jax.block_until_ready(generator_forward(z, params))
    assert img.shape == (N_PATHS * B, CHANNELS, IMG_SIZE, IMG_SIZE), img.shape

    ref = reference_forward(z, params)
    if not jnp.allclose(img, ref, atol=1e-5, rtol=1e-5):
        err = float(jnp.max(jnp.abs(img - ref)))
        raise AssertionError(f"Pallas output does not match reference (max err {err})")

    # TODO(synk): BatchNorm1d running-mean/var buffer updates (a training-mode
    # side effect of the module, not part of the returned tensor) are not modeled.
    print("KERNEL_OK")
</pallas_src>

<mosaic_0001>
module attributes {stable_mosaic.version = 11 : i64} {
  func.func @_generator_fused_kernel(%arg0: memref<8x32xf32, #tpu.memory_space<vmem>>, %arg1: memref<32x256xf32, #tpu.memory_space<vmem>>, %arg2: memref<3x256xf32, #tpu.memory_space<vmem>>, %arg3: memref<2x128x512xf32, #tpu.memory_space<vmem>>, %arg4: memref<2x3x512xf32, #tpu.memory_space<vmem>>, %arg5: memref<2x512x64xf32, #tpu.memory_space<vmem>>, %arg6: memref<1x128xf32, #tpu.memory_space<vmem>>, %arg7: memref<8x128xf32, #tpu.memory_space<vmem>>) attributes {dimension_semantics = [], scalar_prefetch = 0 : i64, scratch_operands = 0 : i64, tpu.core_type = #tpu.core_type<tc>} {
    %c0 = arith.constant 0 : index
    %c0_0 = arith.constant 0 : index
    %0 = vector.load %arg0[%c0, %c0_0] : memref<8x32xf32, #tpu.memory_space<vmem>>, vector<8x32xf32>
    %c0_1 = arith.constant 0 : index
    %c0_2 = arith.constant 0 : index
    %1 = vector.load %arg2[%c0_1, %c0_2] : memref<3x256xf32, #tpu.memory_space<vmem>>, vector<3x256xf32>
    %c0_3 = arith.constant 0 : index
    %c0_4 = arith.constant 0 : index
    %2 = vector.load %arg1[%c0_3, %c0_4] : memref<32x256xf32, #tpu.memory_space<vmem>>, vector<32x256xf32>
    %cst = arith.constant dense<0.000000e+00> : vector<8x256xf32>
    %3 = tpu.matmul %0, %2, %cst {dimension_numbers = #tpu.dot_dimension_numbers<[1], [0], [0], [1], [0, 0, 1, 1], [], []>} : vector<8x32xf32>, vector<32x256xf32>, vector<8x256xf32> -> vector<8x256xf32>
    %4 = vector.extract_strided_slice %1 {offsets = [0, 0], sizes = [1, 256], strides = [1, 1]} : vector<3x256xf32> to vector<1x256xf32>
    %5 = vector.broadcast %4 : vector<1x256xf32> to vector<8x256xf32>
    %6 = arith.addf %3, %5 : vector<8x256xf32>
    %cst_5 = arith.constant dense<0.000000e+00> : vector<256xf32>
    %7 = vector.multi_reduction <add>, %6, %cst_5 [0] : vector<8x256xf32> to vector<256xf32>
    %8 = vector.shape_cast %7 : vector<256xf32> to vector<1x256xf32>
    %cst_6 = arith.constant 8.000000e+00 : f32
    %9 = vector.broadcast %cst_6 : f32 to vector<1x256xf32>
    %10 = arith.divf %8, %9 : vector<1x256xf32>
    %11 = vector.broadcast %10 : vector<1x256xf32> to vector<8x256xf32>
    %12 = arith.subf %6, %11 : vector<8x256xf32>
    %13 = arith.mulf %12, %12 : vector<8x256xf32>
    %cst_7 = arith.constant dense<0.000000e+00> : vector<256xf32>
    %14 = vector.multi_reduction <add>, %13, %cst_7 [0] : vector<8x256xf32> to vector<256xf32>
    %15 = vector.shape_cast %14 : vector<256xf32> to vector<1x256xf32>
    %cst_8 = arith.constant 8.000000e+00 : f32
    %16 = vector.broadcast %cst_8 : f32 to vector<1x256xf32>
    %17 = arith.divf %15, %16 : vector<1x256xf32>
    %18 = vector.extract_strided_slice %1 {offsets = [1, 0], sizes = [1, 256], strides = [1, 1]} : vector<3x256xf32> to vector<1x256xf32>
    %cst_9 = arith.constant 8.000000e-01 : f32
    %19 = vector.broadcast %cst_9 : f32 to vector<1x256xf32>
    %20 = arith.addf %17, %19 : vector<1x256xf32>
    %21 = math.rsqrt %20 : vector<1x256xf32>
    %22 = arith.mulf %18, %21 : vector<1x256xf32>
    %23 = vector.broadcast %10 : vector<1x256xf32> to vector<8x256xf32>
    %24 = arith.subf %6, %23 : vector<8x256xf32>
    %25 = vector.broadcast %22 : vector<1x256xf32> to vector<8x256xf32>
    %26 = arith.mulf %24, %25 : vector<8x256xf32>
    %27 = vector.extract_strided_slice %1 {offsets = [2, 0], sizes = [1, 256], strides = [1, 1]} : vector<3x256xf32> to vector<1x256xf32>
    %28 = vector.broadcast %27 : vector<1x256xf32> to vector<8x256xf32>
    %29 = arith.addf %26, %28 : vector<8x256xf32>
    %cst_10 = arith.constant 0.000000e+00 : f32
    %30 = vector.broadcast %cst_10 : f32 to vector<8x256xf32>
    %31 = arith.cmpf oge, %29, %30 : vector<8x256xf32>
    %cst_11 = arith.constant 2.000000e-01 : f32
    %32 = vector.broadcast %cst_11 : f32 to vector<8x256xf32>
    %33 = arith.mulf %32, %29 : vector<8x256xf32>
    %34 = arith.select %31, %29, %33 : vector<8x256xi1>, vector<8x256xf32>
    %35 = vector.extract_strided_slice %34 {offsets = [0, 0], sizes = [8, 128], strides = [1, 1]} : vector<8x256xf32> to vector<8x128xf32>
    %c0_12 = arith.constant 0 : index
    %c0_13 = arith.constant 0 : index
    %c0_14 = arith.constant 0 : index
    %36 = vector.load %arg4[%c0_12, %c0_13, %c0_14] : memref<2x3x512xf32, #tpu.memory_space<vmem>>, vector<1x3x512xf32>
    %37 = vector.shape_cast %36 : vector<1x3x512xf32> to vector<3x512xf32>
    %c0_15 = arith.constant 0 : index
    %c0_16 = arith.constant 0 : index
    %c0_17 = arith.constant 0 : index
    %38 = vector.load %arg3[%c0_15, %c0_16, %c0_17] : memref<2x128x512xf32, #tpu.memory_space<vmem>>, vector<1x128x512xf32>
    %39 = vector.shape_cast %38 : vector<1x128x512xf32> to vector<128x512xf32>
    %cst_18 = arith.constant dense<0.000000e+00> : vector<8x512xf32>
    %40 = tpu.matmul %35, %39, %cst_18 {dimension_numbers = #tpu.dot_dimension_numbers<[1], [0], [0], [1], [0, 0, 1, 1], [], []>} : vector<8x128xf32>, vector<128x512xf32>, vector<8x512xf32> -> vector<8x512xf32>
    %41 = vector.extract_strided_slice %37 {offsets = [0, 0], sizes = [1, 512], strides = [1, 1]} : vector<3x512xf32> to vector<1x512xf32>
    %42 = vector.broadcast %41 : vector<1x512xf32> to vector<8x512xf32>
    %43 = arith.addf %40, %42 : vector<8x512xf32>
    %cst_19 = arith.constant dense<0.000000e+00> : vector<512xf32>
    %44 = vector.multi_reduction <add>, %43, %cst_19 [0] : vector<8x512xf32> to vector<512xf32>
    %45 = vector.shape_cast %44 : vector<512xf32> to vector<1x512xf32>
    %cst_20 = arith.constant 8.000000e+00 : f32
    %46 = vector.broadcast %cst_20 : f32 to vector<1x512xf32>
    %47 = arith.divf %45, %46 : vector<1x512xf32>
    %48 = vector.broadcast %47 : vector<1x512xf32> to vector<8x512xf32>
    %49 = arith.subf %43, %48 : vector<8x512xf32>
    %50 = arith.mulf %49, %49 : vector<8x512xf32>
    %cst_21 = arith.constant dense<0.000000e+00> : vector<512xf32>
    %51 = vector.multi_reduction <add>, %50, %cst_21 [0] : vector<8x512xf32> to vector<512xf32>
    %52 = vector.shape_cast %51 : vector<512xf32> to vector<1x512xf32>
    %cst_22 = arith.constant 8.000000e+00 : f32
    %53 = vector.broadcast %cst_22 : f32 to vector<1x512xf32>
    %54 = arith.divf %52, %53 : vector<1x512xf32>
    %55 = vector.extract_strided_slice %37 {offsets = [1, 0], sizes = [1, 512], strides = [1, 1]} : vector<3x512xf32> to vector<1x512xf32>
    %cst_23 = arith.constant 8.000000e-01 : f32
    %56 = vector.broadcast %cst_23 : f32 to vector<1x512xf32>
    %57 = arith.addf %54, %56 : vector<1x512xf32>
    %58 = math.rsqrt %57 : vector<1x512xf32>
    %59 = arith.mulf %55, %58 : vector<1x512xf32>
    %60 = vector.broadcast %47 : vector<1x512xf32> to vector<8x512xf32>
    %61 = arith.subf %43, %60 : vector<8x512xf32>
    %62 = vector.broadcast %59 : vector<1x512xf32> to vector<8x512xf32>
    %63 = arith.mulf %61, %62 : vector<8x512xf32>
    %64 = vector.extract_strided_slice %37 {offsets = [2, 0], sizes = [1, 512], strides = [1, 1]} : vector<3x512xf32> to vector<1x512xf32>
    %65 = vector.broadcast %64 : vector<1x512xf32> to vector<8x512xf32>
    %66 = arith.addf %63, %65 : vector<8x512xf32>
    %cst_24 = arith.constant 0.000000e+00 : f32
    %67 = vector.broadcast %cst_24 : f32 to vector<8x512xf32>
    %68 = arith.cmpf oge, %66, %67 : vector<8x512xf32>
    %cst_25 = arith.constant 2.000000e-01 : f32
    %69 = vector.broadcast %cst_25 : f32 to vector<8x512xf32>
    %70 = arith.mulf %69, %66 : vector<8x512xf32>
    %71 = arith.select %68, %66, %70 : vector<8x512xi1>, vector<8x512xf32>
    %c0_26 = arith.constant 0 : index
    %c0_27 = arith.constant 0 : index
    %c0_28 = arith.constant 0 : index
    %72 = vector.load %arg5[%c0_26, %c0_27, %c0_28] : memref<2x512x64xf32, #tpu.memory_space<vmem>>, vector<1x512x64xf32>
    %73 = vector.shape_cast %72 : vector<1x512x64xf32> to vector<512x64xf32>
    %cst_29 = arith.constant dense<0.000000e+00> : vector<8x64xf32>
    %74 = tpu.matmul %71, %73, %cst_29 {dimension_numbers = #tpu.dot_dimension_numbers<[1], [0], [0], [1], [0, 0, 1, 1], [], []>} : vector<8x512xf32>, vector<512x64xf32>, vector<8x64xf32> -> vector<8x64xf32>
    %75 = vector.extract_strided_slice %34 {offsets = [0, 128], sizes = [8, 128], strides = [1, 1]} : vector<8x256xf32> to vector<8x128xf32>
    %c1 = arith.constant 1 : index
    %c0_30 = arith.constant 0 : index
    %c0_31 = arith.constant 0 : index
    %76 = vector.load %arg4[%c1, %c0_30, %c0_31] : memref<2x3x512xf32, #tpu.memory_space<vmem>>, vector<1x3x512xf32>
    %77 = vector.shape_cast %76 : vector<1x3x512xf32> to vector<3x512xf32>
    %c1_32 = arith.constant 1 : index
    %c0_33 = arith.constant 0 : index
    %c0_34 = arith.constant 0 : index
    %78 = vector.load %arg3[%c1_32, %c0_33, %c0_34] : memref<2x128x512xf32, #tpu.memory_space<vmem>>, vector<1x128x512xf32>
    %79 = vector.shape_cast %78 : vector<1x128x512xf32> to vector<128x512xf32>
    %cst_35 = arith.constant dense<0.000000e+00> : vector<8x512xf32>
    %80 = tpu.matmul %75, %79, %cst_35 {dimension_numbers = #tpu.dot_dimension_numbers<[1], [0], [0], [1], [0, 0, 1, 1], [], []>} : vector<8x128xf32>, vector<128x512xf32>, vector<8x512xf32> -> vector<8x512xf32>
    %81 = vector.extract_strided_slice %77 {offsets = [0, 0], sizes = [1, 512], strides = [1, 1]} : vector<3x512xf32> to vector<1x512xf32>
    %82 = vector.broadcast %81 : vector<1x512xf32> to vector<8x512xf32>
    %83 = arith.addf %80, %82 : vector<8x512xf32>
    %cst_36 = arith.constant dense<0.000000e+00> : vector<512xf32>
    %84 = vector.multi_reduction <add>, %83, %cst_36 [0] : vector<8x512xf32> to vector<512xf32>
    %85 = vector.shape_cast %84 : vector<512xf32> to vector<1x512xf32>
    %cst_37 = arith.constant 8.000000e+00 : f32
    %86 = vector.broadcast %cst_37 : f32 to vector<1x512xf32>
    %87 = arith.divf %85, %86 : vector<1x512xf32>
    %88 = vector.broadcast %87 : vector<1x512xf32> to vector<8x512xf32>
    %89 = arith.subf %83, %88 : vector<8x512xf32>
    %90 = arith.mulf %89, %89 : vector<8x512xf32>
    %cst_38 = arith.constant dense<0.000000e+00> : vector<512xf32>
    %91 = vector.multi_reduction <add>, %90, %cst_38 [0] : vector<8x512xf32> to vector<512xf32>
    %92 = vector.shape_cast %91 : vector<512xf32> to vector<1x512xf32>
    %cst_39 = arith.constant 8.000000e+00 : f32
    %93 = vector.broadcast %cst_39 : f32 to vector<1x512xf32>
    %94 = arith.divf %92, %93 : vector<1x512xf32>
    %95 = vector.extract_strided_slice %77 {offsets = [1, 0], sizes = [1, 512], strides = [1, 1]} : vector<3x512xf32> to vector<1x512xf32>
    %cst_40 = arith.constant 8.000000e-01 : f32
    %96 = vector.broadcast %cst_40 : f32 to vector<1x512xf32>
    %97 = arith.addf %94, %96 : vector<1x512xf32>
    %98 = math.rsqrt %97 : vector<1x512xf32>
    %99 = arith.mulf %95, %98 : vector<1x512xf32>
    %100 = vector.broadcast %87 : vector<1x512xf32> to vector<8x512xf32>
    %101 = arith.subf %83, %100 : vector<8x512xf32>
    %102 = vector.broadcast %99 : vector<1x512xf32> to vector<8x512xf32>
    %103 = arith.mulf %101, %102 : vector<8x512xf32>
    %104 = vector.extract_strided_slice %77 {offsets = [2, 0], sizes = [1, 512], strides = [1, 1]} : vector<3x512xf32> to vector<1x512xf32>
    %105 = vector.broadcast %104 : vector<1x512xf32> to vector<8x512xf32>
    %106 = arith.addf %103, %105 : vector<8x512xf32>
    %cst_41 = arith.constant 0.000000e+00 : f32
    %107 = vector.broadcast %cst_41 : f32 to vector<8x512xf32>
    %108 = arith.cmpf oge, %106, %107 : vector<8x512xf32>
    %cst_42 = arith.constant 2.000000e-01 : f32
    %109 = vector.broadcast %cst_42 : f32 to vector<8x512xf32>
    %110 = arith.mulf %109, %106 : vector<8x512xf32>
    %111 = arith.select %108, %106, %110 : vector<8x512xi1>, vector<8x512xf32>
    %c1_43 = arith.constant 1 : index
    %c0_44 = arith.constant 0 : index
    %c0_45 = arith.constant 0 : index
    %112 = vector.load %arg5[%c1_43, %c0_44, %c0_45] : memref<2x512x64xf32, #tpu.memory_space<vmem>>, vector<1x512x64xf32>
    %113 = vector.shape_cast %112 : vector<1x512x64xf32> to vector<512x64xf32>
    %cst_46 = arith.constant dense<0.000000e+00> : vector<8x64xf32>
    %114 = tpu.matmul %111, %113, %cst_46 {dimension_numbers = #tpu.dot_dimension_numbers<[1], [0], [0], [1], [0, 0, 1, 1], [], []>} : vector<8x512xf32>, vector<512x64xf32>, vector<8x64xf32> -> vector<8x64xf32>
    %115 = tpu.concatenate %74, %114 in 1 : vector<8x64xf32>, vector<8x64xf32> -> vector<8x128xf32>
    %c0_47 = arith.constant 0 : index
    %c0_48 = arith.constant 0 : index
    %116 = vector.load %arg6[%c0_47, %c0_48] : memref<1x128xf32, #tpu.memory_space<vmem>>, vector<1x128xf32>
    %117 = vector.broadcast %116 : vector<1x128xf32> to vector<8x128xf32>
    %118 = arith.addf %115, %117 : vector<8x128xf32>
    %119 = math.tanh %118 : vector<8x128xf32>
    %c0_49 = arith.constant 0 : index
    %c0_50 = arith.constant 0 : index
    %120 = vector.load %arg7[%c0_49, %c0_50] : memref<8x128xf32, #tpu.memory_space<vmem>>, vector<8x128xf32>
    tpu.vector_store %arg7[%c0_49, %c0_50], %119 {strides = array<i32>} : memref<8x128xf32, #tpu.memory_space<vmem>>, vector<8x128xf32>,
    return
  }
}

</mosaic_0001>

<bundles_post_ra>
// kernel: tpu_custom_call.1
= control target key start
LH: loop header
LB: loop body
LE: loop exit
PB: predicated region body
PF: predicated region fallthrough
CT: control target
= control target key end

     0   :  { %s2410_s0 = inlined_call_operand.vmem [shape: f32[8,32], index: 0, kind: input, shape index: {}]   ;;  %s2411_s1 = inlined_call_operand.vmem [shape: f32[32,256], index: 1, kind: input, shape index: {}]   ;;  %s2412_s2 = inlined_call_operand.vmem [shape: f32[3,256], index: 2, kind: input, shape index: {}]   ;;  %s2413_s3 = inlined_call_operand.vmem [shape: f32[2,128,512], index: 3, kind: input, shape index: {}]   ;;  %s2414_s4 = inlined_call_operand.vmem [shape: f32[2,3,512], index: 4, kind: input, shape index: {}]   ;;  %s2415_s5 = inlined_call_operand.vmem [shape: f32[2,512,64], index: 5, kind: input, shape index: {}]   ;;  %s2416_s6 = inlined_call_operand.vmem [shape: f32[1,128], index: 6, kind: input, shape index: {}]   ;;  %s2417_s7 = inlined_call_operand.hbm [shape: f32[8,128], index: 7, kind: output, shape index: {}]  }
   0x1   :  { %v35_v0 = vld [vmem:[%s2411_s1 + $0x30] sm:$0xff]  ;;  %v36_v1 = vld [vmem:[%s2411_s1 + $0x38] sm:$0xff]  ;;  %v33_v2 = vld [vmem:[%s2411_s1 + $0x20] sm:$0xff] }
   0x2   :  { %60 = vmatpush.msra.mxu0 %v35_v0  ;;  %80 = vmatpush.msra.mxu1 %v36_v1  ;;  %v34_v3 = vld [vmem:[%s2411_s1 + $0x28] sm:$0xff]  ;;  %v31_v4 = vld [vmem:[%s2411_s1 + $0x10] sm:$0xff]  ;;  %v32_v5 = vld [vmem:[%s2411_s1 + $0x18] sm:$0xff] }
   0x4   :  { %61 = vmatpush.msra.mxu0 %v33_v2  ;;  %81 = vmatpush.msra.mxu1 %v34_v3 }
   0x5   :  { %12 = vsyncpa [#allocation3], 0  ;;  %v29_v6 = vld [vmem:[%s2411_s1] sm:$0xff]  ;;  %v30_v7 = vld [vmem:[%s2411_s1 + $0x8] sm:$0xff]  ;;  %vm44_vm0 = vcmask 261120   ;;  %v1343_v9 = vmov 8.0  }
   0x6   :  { %62 = vmatpush.msra.mxu0 %v31_v4  ;;  %82 = vmatpush.msra.mxu1 %v32_v5  ;;  %v27_v8 = vld [vmem:[%s2410_s0] sm:$0xff]  ;;  %1292 = vrcp.f32 %v1343_v9  ;;  %v243_v33 = vld [vmem:[%s2413_s3 + $0x1e8] sm:$0xff]  ;;  %v244_v34 = vld [vmem:[%s2413_s3 + $0x1f0] sm:$0xff]  ;;  %vm152_vm7 = vcmask 1043456   ;;  %s1345_s28 = smov [#allocation2]  }
   0x7   :  { %v1416_v10 = vld [vmem:[%s2412_s2] sm:$0x77]  ;;  %280 = vmatpush.msra.mxu3 %v243_v33  ;;  %v245_v37 = vld [vmem:[%s2413_s3 + $0x1f8] sm:$0xff]  ;;  %v239_v40 = vld [vmem:[%s2413_s3 + $0x1c8] sm:$0xff]  ;;  %s1145_s29 = sshll.u32 %s1345_s28, 4  ;;  %s1146_s29 = int_to_ptr.vmem [resolvable:$true] %s1145_s29 }
   0x8   :  { %63 = vmatpush.msra.mxu0 %v29_v6  ;;  %83 = vmatpush.msra.mxu1 %v30_v7  ;;  %v38_v12 = vperm.slane %v1416_v10, 0  ;;  %v39_v13 = vperm.slane %v1416_v10, 4  ;;  %v242_v32 = vld [vmem:[%s2413_s3 + $0x1e0] sm:$0xff]  ;;  %v240_v41 = vld [vmem:[%s2413_s3 + $0x1d0] sm:$0xff]  ;;  %v241_v44 = vld [vmem:[%s2413_s3 + $0x1d8] sm:$0xff] }
   0x9   :  { %1156 = vmatmul.msk.f32.vlgmr.msra.gmra.mxu0 %vm44_vm0, %v27_v8  ;;  %1157 = vmatmul.msk.f32.vlgmr.msra.gmra.mxu1 %vm44_vm0, %v27_v8  ;;  %v238_v39 = vld [vmem:[%s2413_s3 + $0x1c0] sm:$0xff]  ;;  %v235_v46 = vld [vmem:[%s2413_s3 + $0x1a8] sm:$0xff]  ;;  %v236_v47 = vld [vmem:[%s2413_s3 + $0x1b0] sm:$0xff] }
   0xa   :  { %v42_v15 = vperm.slane %v38_v12, 0  ;;  %v43_v16 = vperm.slane %v39_v13, 0  ;;  %260 = vmatpush.msra.mxu2 %v242_v32  ;;  %300 = vmatpush.msrb.mxu0 %v244_v34  ;;  %v234_v45 = vld [vmem:[%s2413_s3 + $0x1a0] sm:$0xff]  ;;  %v237_v50 = vld [vmem:[%s2413_s3 + $0x1b8] sm:$0xff]  ;;  %v231_v52 = vld [vmem:[%s2413_s3 + $0x188] sm:$0xff] }
   0xb   :  { %320 = vmatpush.msrb.mxu1 %v245_v37  ;;  %281 = vmatpush.msra.mxu3 %v239_v40  ;;  %v230_v51 = vld [vmem:[%s2413_s3 + $0x180] sm:$0xff]  ;;  %v232_v53 = vld [vmem:[%s2413_s3 + $0x190] sm:$0xff]  ;;  %v233_v56 = vld [vmem:[%s2413_s3 + $0x198] sm:$0xff] }
   0xc   :  { %v1293_v11 = vpop.eup %1292  ;;  %261 = vmatpush.msra.mxu2 %v238_v39  ;;  %301 = vmatpush.msrb.mxu0 %v240_v41  ;;  %v226_v57 = vld [vmem:[%s2413_s3 + $0x160] sm:$0xff]  ;;  %v227_v58 = vld [vmem:[%s2413_s3 + $0x168] sm:$0xff]  ;;  %v228_v59 = vld [vmem:[%s2413_s3 + $0x170] sm:$0xff] }
   0xd   :  { %v101_v14 = vmul.f32 8.0, %v1293_v11  ;;  %vm105_vm1 = vweird.f32 %v1293_v11  ;;  %321 = vmatpush.msrb.mxu1 %v241_v44  ;;  %282 = vmatpush.msra.mxu3 %v235_v46  ;;  %v229_v62 = vld [vmem:[%s2413_s3 + $0x178] sm:$0xff]  ;;  %v222_v63 = vld [vmem:[%s2413_s3 + $0x140] sm:$0xff]  ;;  %v223_v0 = vld [vmem:[%s2413_s3 + $0x148] sm:$0xff] }
   0xe   :  { %262 = vmatpush.msra.mxu2 %v234_v45  ;;  %302 = vmatpush.msrb.mxu0 %v236_v47  ;;  %v224_v1 = vld [vmem:[%s2413_s3 + $0x150] sm:$0xff]  ;;  %v225_v4 = vld [vmem:[%s2413_s3 + $0x158] sm:$0xff]  ;;  %v218_v5 = vld [vmem:[%s2413_s3 + $0x120] sm:$0xff] }
   0xf   :  { %v102_v18 = vsub.f32 1.0, %v101_v14  ;;  %322 = vmatpush.msrb.mxu1 %v237_v50  ;;  %283 = vmatpush.msra.mxu3 %v231_v52  ;;  %v219_v6 = vld [vmem:[%s2413_s3 + $0x128] sm:$0xff]  ;;  %v220_v7 = vld [vmem:[%s2413_s3 + $0x130] sm:$0xff]  ;;  %v214_v12 = vld [vmem:[%s2413_s3 + $0x100] sm:$0xff] }
  0x10   :  { %263 = vmatpush.msra.mxu2 %v230_v51  ;;  %303 = vmatpush.msrb.mxu0 %v232_v53  ;;  %v215_v13 = vld [vmem:[%s2413_s3 + $0x108] sm:$0xff]  ;;  %v216_v14 = vld [vmem:[%s2413_s3 + $0x110] sm:$0xff]  ;;  %v193_v52 = vld [vmem:[%s2413_s3 + $0x58] sm:$0xff] }
  0x11   :  { %v103_v24 = vmul.f32 %v1293_v11, %v102_v18  ;;  %323 = vmatpush.msrb.mxu1 %v233_v56  ;;  %284 = vmatpush.msra.mxu3 %v227_v58  ;;  %v210_v18 = vld [vmem:[%s2413_s3 + $0xe0] sm:$0xff]  ;;  %v204_v32 = vld [vmem:[%s2413_s3 + $0xb0] sm:$0xff]  ;;  %v199_v37 = vld [vmem:[%s2413_s3 + $0x88] sm:$0xff] }
  0x12   :  { %264 = vmatpush.msra.mxu2 %v226_v57  ;;  %304 = vmatpush.msrb.mxu0 %v228_v59  ;;  %v200_v39 = vld [vmem:[%s2413_s3 + $0x90] sm:$0xff]  ;;  %v195_v44 = vld [vmem:[%s2413_s3 + $0x68] sm:$0xff]  ;;  %v186_v53 = vld [vmem:[%s2413_s3 + $0x20] sm:$0xff] }
  0x13   :  { %v104_v29 = vadd.f32 %v1293_v11, %v103_v24  ;;  %324 = vmatpush.msrb.mxu1 %v229_v62  ;;  %285 = vmatpush.msra.mxu3 %v223_v0  ;;  %v206_v24 = vld [vmem:[%s2413_s3 + $0xc0] sm:$0xff]  ;;  %v196_v45 = vld [vmem:[%s2413_s3 + $0x70] sm:$0xff]  ;;  %v191_v50 = vld [vmem:[%s2413_s3 + $0x48] sm:$0xff] }
  0x14   :  { %265 = vmatpush.msra.mxu2 %v222_v63  ;;  %305 = vmatpush.msrb.mxu0 %v224_v1  ;;  %v192_v51 = vld [vmem:[%s2413_s3 + $0x50] sm:$0xff]  ;;  %v187_v56 = vld [vmem:[%s2413_s3 + $0x28] sm:$0xff]  ;;  %v189_v58 = vld [vmem:[%s2413_s3 + $0x38] sm:$0xff] }
  0x15   :  { %v1432_v38 = vsel %vm105_vm1, %v1293_v11, %v104_v29  ;;  %325 = vmatpush.msrb.mxu1 %v225_v4  ;;  %286 = vmatpush.msra.mxu3 %v219_v6  ;;  %v221_v11 = vld [vmem:[%s2413_s3 + $0x138] sm:$0xff]  ;;  %v188_v57 = vld [vmem:[%s2413_s3 + $0x30] sm:$0xff]  ;;  %v182_v59 = vld [vmem:[%s2413_s3] sm:$0xff] }
  0x16   :  { %266 = vmatpush.msra.mxu2 %v218_v5  ;;  %306 = vmatpush.msrb.mxu0 %v220_v7  ;;  %v209_v29 = vld [vmem:[%s2413_s3 + $0xd8] sm:$0xff] }
  0x17   :  { %326 = vmatpush.msrb.mxu1 %v221_v11  ;;  %287 = vmatpush.msra.mxu3 %v215_v13  ;;  %v185_v62 = vld [vmem:[%s2413_s3 + $0x18] sm:$0xff] }
  0x18   :  { %267 = vmatpush.msra.mxu2 %v214_v12  ;;  %307 = vmatpush.msrb.mxu0 %v216_v14 }
  0x1a   :  { %268 = vmatpush.msra.mxu2 %v210_v18  ;;  %v166_v18 = vperm.slane %v1416_v10, 2 }
  0x1c   :  { %269 = vmatpush.msra.mxu2 %v206_v24 }
  0x86   :  { %v65_v17 = vpop.f32.mrf.mxu0  ;;  %v85_v19 = vpop.f32.mrf.mxu1 }
  0x87   :  { %v66_v20 = vadd.f32 %v65_v17, %v42_v15  ;;  %v86_v21 = vadd.f32 %v85_v19, %v43_v16  ;;  %v217_v17 = vld [vmem:[%s2413_s3 + $0x118] sm:$0xff]  ;;  %v211_v19 = vld [vmem:[%s2413_s3 + $0xe8] sm:$0xff] }
  0x88   :  { %327 = vmatpush.msrb.mxu1 %v217_v17  ;;  %288 = vmatpush.msra.mxu3 %v211_v19 }
  0x89   :  { %v88_v22 = vrot.slane %v66_v20, 4  ;;  %v94_v23 = vrot.slane %v86_v21, 4 }
  0x8b   :  { %v89_v25 = vadd.f32 %v88_v22, %v66_v20  ;;  %v95_v26 = vadd.f32 %v94_v23, %v86_v21  ;;  %v213_v23 = vld [vmem:[%s2413_s3 + $0xf8] sm:$0xff] }
  0x8c   :  { %328 = vmatpush.msrb.mxu1 %v213_v23  ;;  %v170_v23 = vperm.slane %v166_v18, 2  ;;  %v546_v18 = vld [vmem:[%s2415_s5 + $0x130] sm:$0xff] }
  0x8d   :  { %v90_v27 = vrot.slane %v89_v25, 2  ;;  %v96_v28 = vrot.slane %v95_v26, 2 }
  0x8e   :  { %329 = vmatpush.msrb.mxu1 %v209_v29  ;;  %v571_v29 = vld [vmem:[%s2415_s5 + $0x1f8] sm:$0xff] }
  0x8f   :  { %v91_v30 = vadd.f32 %v90_v27, %v89_v25  ;;  %v97_v31 = vadd.f32 %v96_v28, %v95_v26  ;;  %v207_v25 = vld [vmem:[%s2413_s3 + $0xc8] sm:$0xff]  ;;  %v208_v26 = vld [vmem:[%s2413_s3 + $0xd0] sm:$0xff] }
  0x90   :  { %289 = vmatpush.msra.mxu3 %v207_v25 }
  0x91   :  { %v92_v35 = vrot.slane %v91_v30, 1  ;;  %v98_v36 = vrot.slane %v97_v31, 1 }
  0x93   :  { %v93_v42 = vadd.f32 %v92_v35, %v91_v30  ;;  %v99_v43 = vadd.f32 %v98_v36, %v97_v31  ;;  %v202_v30 = vld [vmem:[%s2413_s3 + $0xa0] sm:$0xff]  ;;  %v203_v31 = vld [vmem:[%s2413_s3 + $0xa8] sm:$0xff]  ;;  %v205_v35 = vld [vmem:[%s2413_s3 + $0xb8] sm:$0xff] }
  0x94   :  { %270 = vmatpush.msra.mxu2 %v202_v30  ;;  %290 = vmatpush.msra.mxu3 %v203_v31  ;;  %v198_v36 = vld [vmem:[%s2413_s3 + $0x80] sm:$0xff]  ;;  %v1648_v30 = vld [vmem:[%s2414_s4 + $0x8] sm:$0x77] }
  0x95   :  { %v107_v48 = vmul.f32 %v1432_v38, %v93_v42  ;;  %v108_v49 = vmul.f32 %v1432_v38, %v99_v43  ;;  %330 = vmatpush.msrb.mxu1 %v205_v35  ;;  %v201_v42 = vld [vmem:[%s2413_s3 + $0x98] sm:$0xff]  ;;  %v194_v43 = vld [vmem:[%s2413_s3 + $0x60] sm:$0xff]  ;;  %v553_v31 = vld [vmem:[%s2415_s5 + $0x168] sm:$0xff] }
  0x96   :  { %271 = vmatpush.msra.mxu2 %v198_v36  ;;  %291 = vmatpush.msra.mxu3 %v199_v37  ;;  %v523_v35 = vld [vmem:[%s2415_s5 + $0x78] sm:$0xff]  ;;  %v552_v37 = vld [vmem:[%s2415_s5 + $0x160] sm:$0xff] }
  0x97   :  { %v1469_v54 = vsub.f32 %v66_v20, %v107_v48  ;;  %v1471_v55 = vsub.f32 %v86_v21, %v108_v49  ;;  %v212_v20 = vld [vmem:[%s2413_s3 + $0xf0] sm:$0xff]  ;;  %331 = vmatpush.msrb.mxu1 %v201_v42  ;;  %v197_v48 = vld [vmem:[%s2413_s3 + $0x78] sm:$0xff]  ;;  %v190_v49 = vld [vmem:[%s2413_s3 + $0x40] sm:$0xff] }
  0x98   :  { %308 = vmatpush.msrb.mxu0 %v212_v20  ;;  %272 = vmatpush.msra.mxu2 %v194_v43  ;;  %v539_v36 = vld [vmem:[%s2415_s5 + $0xf8] sm:$0xff]  ;;  %v538_v42 = vld [vmem:[%s2415_s5 + $0xf0] sm:$0xff] }
  0x99   :  { %v111_v60 = vmul.f32 %v1469_v54, %v1469_v54  ;;  %v112_v61 = vmul.f32 %v1471_v55, %v1471_v55  ;;  %292 = vmatpush.msra.mxu3 %v195_v44  ;;  %332 = vmatpush.msrb.mxu1 %v197_v48  ;;  %v551_v43 = vld [vmem:[%s2415_s5 + $0x158] sm:$0xff]  ;;  %v537_v48 = vld [vmem:[%s2415_s5 + $0xe8] sm:$0xff] }
  0x9a   :  { %309 = vmatpush.msrb.mxu0 %v208_v26  ;;  %273 = vmatpush.msra.mxu2 %v190_v49  ;;  %v567_v44 = vld [vmem:[%s2415_s5 + $0x1d8] sm:$0xff]  ;;  %v550_v49 = vld [vmem:[%s2415_s5 + $0x150] sm:$0xff] }
  0x9b   :  { %v113_v2 = vrot.slane %v111_v60, 4  ;;  %v119_v3 = vrot.slane %v112_v61, 4  ;;  %293 = vmatpush.msra.mxu3 %v191_v50  ;;  %333 = vmatpush.msrb.mxu1 %v193_v52  ;;  %v566_v52 = vld [vmem:[%s2415_s5 + $0x1d0] sm:$0xff] }
  0x9c   :  { %310 = vmatpush.msrb.mxu0 %v204_v32  ;;  %274 = vmatpush.msra.mxu2 %v186_v53  ;;  %v569_v32 = vld [vmem:[%s2415_s5 + $0x1e8] sm:$0xff]  ;;  %v520_v53 = vld [vmem:[%s2415_s5 + $0x60] sm:$0xff] }
  0x9d   :  { %v114_v8 = vadd.f32 %v113_v2, %v111_v60  ;;  %v120_v9 = vadd.f32 %v119_v3, %v112_v61  ;;  %v183_v60 = vld [vmem:[%s2413_s3 + $0x8] sm:$0xff]  ;;  %294 = vmatpush.msra.mxu3 %v187_v56  ;;  %v184_v61 = vld [vmem:[%s2413_s3 + $0x10] sm:$0xff]  ;;  %334 = vmatpush.msrb.mxu1 %v189_v58  ;;  %v536_v56 = vld [vmem:[%s2415_s5 + $0xe0] sm:$0xff] }
  0x9e   :  { %311 = vmatpush.msrb.mxu0 %v200_v39  ;;  %275 = vmatpush.msra.mxu2 %v182_v59  ;;  %v1670_v39 = vld [vmem:[%s2414_s4] sm:$0x77] }
  0x9f   :  { %v115_v15 = vrot.slane %v114_v8, 2  ;;  %v121_v16 = vrot.slane %v120_v9, 2  ;;  %295 = vmatpush.msra.mxu3 %v183_v60  ;;  %335 = vmatpush.msrb.mxu1 %v185_v62  ;;  %v248_v50 = vperm.slane %v1670_v39, 0  ;;  %v565_v60 = vld [vmem:[%s2415_s5 + $0x1c8] sm:$0xff] }
  0xa0   :  { %312 = vmatpush.msrb.mxu0 %v196_v45  ;;  %572 = vmatpush.msrb.mxu2 %v523_v35 }
  0xa1   :  { %v116_v21 = vadd.f32 %v115_v15, %v114_v8  ;;  %v122_v22 = vadd.f32 %v121_v16, %v120_v9  ;;  %632 = vmatpush.msra.mxu1 %v571_v29  ;;  %592 = vmatpush.msrb.mxu3 %v539_v36  ;;  %v561_v29 = vld [vmem:[%s2415_s5 + $0x1a8] sm:$0xff]  ;;  %v560_v36 = vld [vmem:[%s2415_s5 + $0x1a0] sm:$0xff] }
  0xa2   :  { %313 = vmatpush.msrb.mxu0 %v192_v51  ;;  %v249_v51 = vperm.slane %v1670_v39, 4 }
  0xa3   :  { %v117_v27 = vrot.slane %v116_v21, 1  ;;  %v123_v28 = vrot.slane %v122_v22, 1  ;;  %593 = vmatpush.msrb.mxu3 %v538_v42  ;;  %v530_v42 = vld [vmem:[%s2415_s5 + $0xb0] sm:$0xff] }
  0xa4   :  { %314 = vmatpush.msrb.mxu0 %v188_v57  ;;  %v549_v57 = vld [vmem:[%s2415_s5 + $0x148] sm:$0xff] }
  0xa5   :  { %v118_v33 = vadd.f32 %v117_v27, %v116_v21  ;;  %v124_v34 = vadd.f32 %v123_v28, %v122_v22  ;;  %594 = vmatpush.msrb.mxu3 %v537_v48 }
  0xa6   :  { %315 = vmatpush.msrb.mxu0 %v184_v61 }
  0xa7   :  { %v125_v40 = vmul.f32 %v118_v33, %v1432_v38  ;;  %v126_v41 = vmul.f32 %v124_v34, %v1432_v38  ;;  %v250_v33 = vperm.slane %v1648_v30, 0  ;;  %v251_v34 = vperm.slane %v1648_v30, 4  ;;  %595 = vmatpush.msrb.mxu3 %v536_v56  ;;  %v558_v56 = vld [vmem:[%s2415_s5 + $0x190] sm:$0xff] }
  0xa9   :  { %v127_v46 = vadd.f32 0.8, %v125_v40  ;;  %v128_v47 = vadd.f32 0.8, %v126_v41  ;;  %v568_v40 = vld [vmem:[%s2415_s5 + $0x1e0] sm:$0xff]  ;;  %v522_v41 = vld [vmem:[%s2415_s5 + $0x70] sm:$0xff] }
  0xaa   :  { %573 = vmatpush.msrb.mxu2 %v522_v41  ;;  %v258_v45 = vperm.slane %v250_v33, 0  ;;  %v544_v33 = vld [vmem:[%s2415_s5 + $0x120] sm:$0xff]  ;;  %v514_v41 = vld [vmem:[%s2415_s5 + $0x30] sm:$0xff] }
  0xab   :  { %1294 = vrsqrt.f32 %v127_v46  ;;  %vm145_vm4 = vweird.f32 %v128_v47  ;;  %vm135_vm6 = vweird.f32 %v127_v46 }
  0xac   :  { %1296 = vrsqrt.f32 %v128_v47 }
  0xb1   :  { %v1295_v63 = vpop.eup %1294 }
  0xb2   :  { %v1297_v0 = vpop.eup %1296  ;;  %v130_v1 = vmul.f32 %v1295_v63, %v127_v46  ;;  %vm136_vm3 = vweird.f32 %v1295_v63  ;;  %v259_v46 = vperm.slane %v251_v34, 0 }
  0xb3   :  { %v140_v2 = vmul.f32 %v1297_v0, %v128_v47  ;;  %vm146_vm2 = vweird.f32 %v1297_v0  ;;  %vm137_vm8 = vmor %vm135_vm6, %vm136_vm3  ;;  %v521_v47 = vld [vmem:[%s2415_s5 + $0x68] sm:$0xff] }
  0xb4   :  { %v131_v3 = vmul.f32 %v1295_v63, %v130_v1  ;;  %vm147_vm5 = vmor %vm145_vm4, %vm146_vm2  ;;  %574 = vmatpush.msrb.mxu2 %v521_v47  ;;  %v548_v1 = vld [vmem:[%s2415_s5 + $0x140] sm:$0xff] }
  0xb5   :  { %v141_v4 = vmul.f32 %v1297_v0, %v140_v2  ;;  %v256_v2 = vperm.slane %v248_v50, 0  ;;  %v529_v50 = vld [vmem:[%s2415_s5 + $0xa8] sm:$0xff] }
  0xb6   :  { %v132_v5 = vmul.f32 0.5, %v131_v3  ;;  %575 = vmatpush.msrb.mxu2 %v520_v53  ;;  %v257_v3 = vperm.slane %v249_v51, 0  ;;  %v542_v51 = vld [vmem:[%s2415_s5 + $0x110] sm:$0xff] }
  0xb7   :  { %v142_v6 = vmul.f32 0.5, %v141_v4  ;;  %v564_v4 = vld [vmem:[%s2415_s5 + $0x1c0] sm:$0xff] }
  0xb8   :  { %v133_v7 = vsub.f32 1.5, %v132_v5 }
  0xb9   :  { %v143_v8 = vsub.f32 1.5, %v142_v6 }
  0xba   :  { %v134_v9 = vmul.f32 %v1295_v63, %v133_v7  ;;  %v518_v7 = vld [vmem:[%s2415_s5 + $0x50] sm:$0xff] }
  0xbb   :  { %v144_v11 = vmul.f32 %v1297_v0, %v143_v8  ;;  %v534_v8 = vld [vmem:[%s2415_s5 + $0xd0] sm:$0xff] }
  0xbc   :  { %v138_v14 = vsel %vm137_vm8, %v1295_v63, %v134_v9  ;;  %v519_v63 = vld [vmem:[%s2415_s5 + $0x58] sm:$0xff] }
  0xbd   :  { %v148_v12 = vsel %vm147_vm5, %v1297_v0, %v144_v11  ;;  %v535_v0 = vld [vmem:[%s2415_s5 + $0xd8] sm:$0xff]  ;;  %576 = vmatpush.msrb.mxu2 %v519_v63  ;;  %v541_v63 = vld [vmem:[%s2415_s5 + $0x108] sm:$0xff] }
  0xbe   :  { %v151_v13 = vrot.slane %v148_v12, 4  ;;  %596 = vmatpush.msrb.mxu3 %v535_v0  ;;  %v547_v9 = vld [vmem:[%s2415_s5 + $0x138] sm:$0xff] }
  0xbf   :  { %577 = vmatpush.msrb.mxu2 %v518_v7  ;;  %v563_v11 = vld [vmem:[%s2415_s5 + $0x1b8] sm:$0xff]  ;;  %v540_v7 = vld [vmem:[%s2415_s5 + $0x100] sm:$0xff] }
  0xc0   :  { %v153_v15 = vsel %vm152_vm7, %v138_v14, %v151_v13  ;;  %597 = vmatpush.msrb.mxu3 %v534_v8 }
  0xc1   :  { %v154_v16 = vrot.slane %v153_v15, 7 }
  0xc3   :  { %v156_v17 = vmul.f32 %v154_v16, %v1416_v10  ;;  %v555_v10 = vld [vmem:[%s2415_s5 + $0x178] sm:$0xff]  ;;  %v517_v16 = vld [vmem:[%s2415_s5 + $0x48] sm:$0xff] }
  0xc4   :  { %612 = vmatpush.msra.mxu0 %v555_v10  ;;  %578 = vmatpush.msrb.mxu2 %v517_v16 }
  0xc5   :  { %v159_v19 = vperm.slane %v156_v17, 5  ;;  %v158_v20 = vperm.slane %v156_v17, 1  ;;  %v533_v17 = vld [vmem:[%s2415_s5 + $0xc8] sm:$0xff] }
  0xc6   :  { %598 = vmatpush.msrb.mxu3 %v533_v17 }
  0xc7   :  { %v163_v21 = vperm.slane %v159_v19, 1  ;;  %v162_v22 = vperm.slane %v158_v20, 1 }
  0xc9   :  { %v1630_v24 = vmul.f32 %v163_v21, %v1471_v55  ;;  %v164_v25 = vmul.f32 %v162_v22, %v1469_v54  ;;  %v554_v54 = vld [vmem:[%s2415_s5 + $0x170] sm:$0xff] }
  0xca   :  { %v570_v55 = vld [vmem:[%s2415_s5 + $0x1f0] sm:$0xff]  ;;  %613 = vmatpush.msra.mxu0 %v554_v54 }
  0xcb   :  { %v172_v26 = vadd.f32 %v170_v23, %v164_v25  ;;  %633 = vmatpush.msra.mxu1 %v570_v55  ;;  %v562_v21 = vld [vmem:[%s2415_s5 + $0x1b0] sm:$0xff]  ;;  %v516_v25 = vld [vmem:[%s2415_s5 + $0x40] sm:$0xff] }
  0xcc   :  { %614 = vmatpush.msra.mxu0 %v553_v31  ;;  %579 = vmatpush.msrb.mxu2 %v516_v25  ;;  %v515_v31 = vld [vmem:[%s2415_s5 + $0x38] sm:$0xff]  ;;  %v509_v25 = vld [vmem:[%s2415_s5 + $0x8] sm:$0xff] }
  0xcd   :  { %vm174_vm9 = vcmp.ge.f32.partialorder %v172_v26, 0.0  ;;  %v176_v27 = vmul.f32 0.2, %v172_v26  ;;  %634 = vmatpush.msra.mxu1 %v569_v32  ;;  %v531_v32 = vld [vmem:[%s2415_s5 + $0xb8] sm:$0xff] }
  0xce   :  { %615 = vmatpush.msra.mxu0 %v552_v37  ;;  %580 = vmatpush.msrb.mxu2 %v515_v31 }
  0xcf   :  { %v178_v28 = vsel %vm174_vm9, %v172_v26, %v176_v27  ;;  %635 = vmatpush.msra.mxu1 %v568_v40  ;;  %v532_v26 = vld [vmem:[%s2415_s5 + $0xc0] sm:$0xff]  ;;  %v545_v27 = vld [vmem:[%s2415_s5 + $0x128] sm:$0xff] }
  0xd0   :  { %276 = vmatmul.f32.vlgmr.msra.gmra.mxu2 %v178_v28  ;;  %296 = vmatmul.f32.vlgmr.msra.gmra.mxu3 %v178_v28 }
  0xd1   :  { %316 = vmatmul.f32.vlgmr.msrb.gmra.mxu0 %v178_v28  ;;  %336 = vmatmul.f32.vlgmr.msrb.gmra.mxu1 %v178_v28 }
  0xd2   :  { %616 = vmatpush.msra.mxu0 %v551_v43  ;;  %636 = vmatpush.msra.mxu1 %v567_v44  ;;  %v543_v43 = vld [vmem:[%s2415_s5 + $0x118] sm:$0xff] }
  0xd3   :  { %599 = vmatpush.msrb.mxu3 %v532_v26  ;;  %581 = vmatpush.msrb.mxu2 %v514_v41  ;;  %v525_v26 = vld [vmem:[%s2415_s5 + $0x88] sm:$0xff] }
  0xd4   :  { %617 = vmatpush.msra.mxu0 %v550_v49  ;;  %637 = vmatpush.msra.mxu1 %v566_v52  ;;  %v513_v49 = vld [vmem:[%s2415_s5 + $0x28] sm:$0xff] }
  0xd5   :  { %600 = vmatpush.msrb.mxu3 %v531_v32  ;;  %582 = vmatpush.msrb.mxu2 %v513_v49 }
  0xd6   :  { %618 = vmatpush.msra.mxu0 %v549_v57  ;;  %638 = vmatpush.msra.mxu1 %v565_v60  ;;  %v528_v60 = vld [vmem:[%s2415_s5 + $0xa0] sm:$0xff] }
  0xd7   :  { %601 = vmatpush.msrb.mxu3 %v530_v42 }
  0xd8   :  { %619 = vmatpush.msra.mxu0 %v548_v1  ;;  %639 = vmatpush.msra.mxu1 %v564_v4 }
  0xd9   :  { %602 = vmatpush.msrb.mxu3 %v529_v50 }
  0xda   :  { %620 = vmatpush.msra.mxu0 %v547_v9  ;;  %640 = vmatpush.msra.mxu1 %v563_v11  ;;  %v1222_v9 = vld [vmem:[%s2413_s3 + $0x3f0] sm:$0xff]  ;;  %v1223_v11 = vld [vmem:[%s2413_s3 + $0x3f8] sm:$0xff] }
  0xdb   :  { %603 = vmatpush.msrb.mxu3 %v528_v60 }
  0xdc   :  { %621 = vmatpush.msra.mxu0 %v546_v18  ;;  %641 = vmatpush.msra.mxu1 %v562_v21  ;;  %v1218_v18 = vld [vmem:[%s2413_s3 + $0x3d0] sm:$0xff]  ;;  %v1219_v21 = vld [vmem:[%s2413_s3 + $0x3d8] sm:$0xff] }
  0xde   :  { %622 = vmatpush.msra.mxu0 %v545_v27  ;;  %642 = vmatpush.msra.mxu1 %v561_v29  ;;  %v1215_v29 = vld [vmem:[%s2413_s3 + $0x3b8] sm:$0xff] }
  0xe0   :  { %623 = vmatpush.msra.mxu0 %v544_v33  ;;  %643 = vmatpush.msra.mxu1 %v560_v36  ;;  %v1220_v33 = vld [vmem:[%s2413_s3 + $0x3e0] sm:$0xff] }
  0xe2   :  { %624 = vmatpush.msra.mxu0 %v543_v43  ;;  %v1216_v43 = vld [vmem:[%s2413_s3 + $0x3c0] sm:$0xff] }
  0xe4   :  { %625 = vmatpush.msra.mxu0 %v542_v51  ;;  %v1212_v51 = vld [vmem:[%s2413_s3 + $0x3a0] sm:$0xff] }
  0xe6   :  { %626 = vmatpush.msra.mxu0 %v541_v63  ;;  %v1208_v63 = vld [vmem:[%s2413_s3 + $0x380] sm:$0xff] }
  0xe8   :  { %627 = vmatpush.msra.mxu0 %v540_v7 }
  0xea   :  { %774 = vmatpush.msrb.mxu0 %v1222_v9  ;;  %v1194_v9 = vld [vmem:[%s2413_s3 + $0x310] sm:$0xff] }
  0xec   :  { %775 = vmatpush.msrb.mxu0 %v1218_v18  ;;  %v1190_v18 = vld [vmem:[%s2413_s3 + $0x2f0] sm:$0xff] }
 0x14e   :  { %v317_v58 = vpop.f32.mrf.mxu0  ;;  %v337_v59 = vpop.f32.mrf.mxu1 }
 0x14f   :  { %v1713_v61 = vadd.f32 %v317_v58, %v258_v45  ;;  %v1715_v62 = vadd.f32 %v337_v59, %v259_v46  ;;  %v559_v46 = vld [vmem:[%s2415_s5 + $0x198] sm:$0xff]  ;;  %v512_v59 = vld [vmem:[%s2415_s5 + $0x20] sm:$0xff] }
 0x150   :  { %644 = vmatpush.msra.mxu1 %v559_v46  ;;  %583 = vmatpush.msrb.mxu2 %v512_v59 }
 0x151   :  { %v352_v5 = vrot.slane %v1713_v61, 4  ;;  %v358_v6 = vrot.slane %v1715_v62, 4 }
 0x152   :  { %645 = vmatpush.msra.mxu1 %v558_v56 }
 0x153   :  { %v353_v12 = vadd.f32 %v352_v5, %v1713_v61  ;;  %v359_v13 = vadd.f32 %v358_v6, %v1715_v62  ;;  %v277_v14 = vpop.f32.mrf.mxu2  ;;  %v297_v15 = vpop.f32.mrf.mxu3  ;;  %v511_v5 = vld [vmem:[%s2415_s5 + $0x18] sm:$0xff] }
 0x154   :  { %v1754_v19 = vadd.f32 %v277_v14, %v256_v2  ;;  %v1756_v20 = vadd.f32 %v297_v15, %v257_v3  ;;  %v557_v2 = vld [vmem:[%s2415_s5 + $0x188] sm:$0xff]  ;;  %v527_v6 = vld [vmem:[%s2415_s5 + $0x98] sm:$0xff]  ;;  %584 = vmatpush.msrb.mxu2 %v511_v5  ;;  %v510_v14 = vld [vmem:[%s2415_s5 + $0x10] sm:$0xff] }
 0x155   :  { %v354_v22 = vrot.slane %v353_v12, 2  ;;  %v360_v23 = vrot.slane %v359_v13, 2  ;;  %646 = vmatpush.msra.mxu1 %v557_v2  ;;  %604 = vmatpush.msrb.mxu3 %v527_v6  ;;  %v526_v15 = vld [vmem:[%s2415_s5 + $0x90] sm:$0xff]  ;;  %v1199_v6 = vld [vmem:[%s2413_s3 + $0x338] sm:$0xff] }
 0x156   :  { %v340_v28 = vrot.slane %v1754_v19, 4  ;;  %v346_v10 = vrot.slane %v1756_v20, 4  ;;  %585 = vmatpush.msrb.mxu2 %v510_v14 }
 0x157   :  { %v355_v54 = vadd.f32 %v354_v22, %v353_v12  ;;  %v361_v55 = vadd.f32 %v360_v23, %v359_v13  ;;  %605 = vmatpush.msrb.mxu3 %v526_v15 }
 0x158   :  { %v341_v34 = vadd.f32 %v340_v28, %v1754_v19  ;;  %v347_v35 = vadd.f32 %v346_v10, %v1756_v20  ;;  %v1214_v10 = vld [vmem:[%s2413_s3 + $0x3b0] sm:$0xff]  ;;  %586 = vmatpush.msrb.mxu2 %v509_v25 }
 0x159   :  { %v356_v37 = vrot.slane %v355_v54, 1  ;;  %v362_v40 = vrot.slane %v361_v55, 1  ;;  %606 = vmatpush.msrb.mxu3 %v525_v26  ;;  %776 = vmatpush.msrb.mxu0 %v1214_v10  ;;  %v1196_v10 = vld [vmem:[%s2413_s3 + $0x320] sm:$0xff] }
 0x15a   :  { %v342_v44 = vrot.slane %v341_v34, 2  ;;  %v348_v45 = vrot.slane %v347_v35, 2 }
 0x15b   :  { %v357_v47 = vadd.f32 %v356_v37, %v355_v54  ;;  %v363_v48 = vadd.f32 %v362_v40, %v361_v55  ;;  %v1211_v40 = vld [vmem:[%s2413_s3 + $0x398] sm:$0xff] }
 0x15c   :  { %v343_v52 = vadd.f32 %v342_v44, %v341_v34  ;;  %v349_v53 = vadd.f32 %v348_v45, %v347_v35  ;;  %v1221_v34 = vld [vmem:[%s2413_s3 + $0x3e8] sm:$0xff]  ;;  %v1210_v35 = vld [vmem:[%s2413_s3 + $0x390] sm:$0xff] }
 0x15d   :  { %v366_v57 = vmul.f32 %v357_v47, %v1432_v38  ;;  %v367_v58 = vmul.f32 %v363_v48, %v1432_v38  ;;  %v1217_v44 = vld [vmem:[%s2413_s3 + $0x3c8] sm:$0xff]  ;;  %v1206_v45 = vld [vmem:[%s2413_s3 + $0x370] sm:$0xff]  ;;  %777 = vmatpush.msrb.mxu0 %v1210_v35  ;;  %v1207_v48 = vld [vmem:[%s2413_s3 + $0x378] sm:$0xff] }
 0x15e   :  { %v344_v0 = vrot.slane %v343_v52, 1  ;;  %v350_v1 = vrot.slane %v349_v53, 1 }
 0x15f   :  { %v1828_v3 = vsub.f32 %v1713_v61, %v366_v57  ;;  %v1831_v4 = vsub.f32 %v1715_v62, %v367_v58  ;;  %v556_v62 = vld [vmem:[%s2415_s5 + $0x180] sm:$0xff]  ;;  %778 = vmatpush.msrb.mxu0 %v1206_v45  ;;  %v1203_v58 = vld [vmem:[%s2413_s3 + $0x358] sm:$0xff]  ;;  %v1174_v45 = vld [vmem:[%s2413_s3 + $0x270] sm:$0xff] }
 0x160   :  { %v345_v8 = vadd.f32 %v344_v0, %v343_v52  ;;  %v351_v61 = vadd.f32 %v350_v1, %v349_v53  ;;  %647 = vmatpush.msra.mxu1 %v556_v62  ;;  %v1213_v52 = vld [vmem:[%s2413_s3 + $0x3a8] sm:$0xff]  ;;  %v1202_v53 = vld [vmem:[%s2413_s3 + $0x350] sm:$0xff] }
 0x161   :  { %v374_v12 = vmul.f32 %v1828_v3, %v1828_v3  ;;  %v375_v13 = vmul.f32 %v1831_v4, %v1831_v4  ;;  %v1209_v0 = vld [vmem:[%s2413_s3 + $0x388] sm:$0xff]  ;;  %v1198_v1 = vld [vmem:[%s2413_s3 + $0x330] sm:$0xff]  ;;  %779 = vmatpush.msrb.mxu0 %v1202_v53  ;;  %v1171_v53 = vld [vmem:[%s2413_s3 + $0x258] sm:$0xff] }
 0x162   :  { %v364_v16 = vmul.f32 %v345_v8, %v1432_v38  ;;  %v365_v17 = vmul.f32 %v351_v61, %v1432_v38  ;;  %794 = vmatpush.msrb.mxu1 %v1223_v11  ;;  %v1204_v61 = vld [vmem:[%s2413_s3 + $0x360] sm:$0xff]  ;;  %v1205_v62 = vld [vmem:[%s2413_s3 + $0x368] sm:$0xff] }
 0x163   :  { %v388_v22 = vrot.slane %v374_v12, 4  ;;  %v394_v23 = vrot.slane %v375_v13, 4  ;;  %780 = vmatpush.msrb.mxu0 %v1198_v1  ;;  %v1172_v1 = vld [vmem:[%s2413_s3 + $0x260] sm:$0xff] }
 0x164   :  { %v1876_v27 = vsub.f32 %v1754_v19, %v364_v16  ;;  %v1879_v28 = vsub.f32 %v1756_v20, %v365_v17  ;;  %795 = vmatpush.msrb.mxu1 %v1219_v21  ;;  %v508_v19 = vld [vmem:[%s2415_s5] sm:$0xff]  ;;  %v1201_v17 = vld [vmem:[%s2413_s3 + $0x348] sm:$0xff] }
 0x165   :  { %v389_v54 = vadd.f32 %v388_v22, %v374_v12  ;;  %v395_v55 = vadd.f32 %v394_v23, %v375_v13  ;;  %v524_v20 = vld [vmem:[%s2415_s5 + $0x80] sm:$0xff]  ;;  %587 = vmatpush.msrb.mxu2 %v508_v19  ;;  %v1195_v13 = vld [vmem:[%s2413_s3 + $0x318] sm:$0xff]  ;;  %781 = vmatpush.msrb.mxu0 %v1194_v9 }
 0x166   :  { %v372_v31 = vmul.f32 %v1876_v27, %v1876_v27  ;;  %v373_v32 = vmul.f32 %v1879_v28, %v1879_v28  ;;  %796 = vmatpush.msrb.mxu1 %v1215_v29  ;;  %607 = vmatpush.msrb.mxu3 %v524_v20  ;;  %v1200_v16 = vld [vmem:[%s2413_s3 + $0x340] sm:$0xff]  ;;  %v1191_v23 = vld [vmem:[%s2413_s3 + $0x2f8] sm:$0xff]  ;;  %v1197_v29 = vld [vmem:[%s2413_s3 + $0x328] sm:$0xff] }
 0x167   :  { %v390_v36 = vrot.slane %v389_v54, 2  ;;  %v396_v37 = vrot.slane %v395_v55, 2  ;;  %734 = vmatpush.msra.mxu2 %v1220_v33  ;;  %782 = vmatpush.msrb.mxu0 %v1190_v18  ;;  %v1182_v33 = vld [vmem:[%s2413_s3 + $0x2b0] sm:$0xff]  ;;  %v1165_v18 = vld [vmem:[%s2413_s3 + $0x228] sm:$0xff] }
 0x168   :  { %v376_v41 = vrot.slane %v372_v31, 4  ;;  %v382_v42 = vrot.slane %v373_v32, 4  ;;  %754 = vmatpush.msra.mxu3 %v1221_v34  ;;  %797 = vmatpush.msrb.mxu1 %v1211_v40  ;;  %v1183_v34 = vld [vmem:[%s2413_s3 + $0x2b8] sm:$0xff]  ;;  %v1189_v40 = vld [vmem:[%s2413_s3 + $0x2e8] sm:$0xff] }
 0x169   :  { %v391_v46 = vadd.f32 %v390_v36, %v389_v54  ;;  %v397_v47 = vadd.f32 %v396_v37, %v395_v55  ;;  %735 = vmatpush.msra.mxu2 %v1216_v43  ;;  %v1186_v54 = vld [vmem:[%s2413_s3 + $0x2d0] sm:$0xff]  ;;  %v1187_v55 = vld [vmem:[%s2413_s3 + $0x2d8] sm:$0xff]  ;;  %v1188_v37 = vld [vmem:[%s2413_s3 + $0x2e0] sm:$0xff] }
 0x16a   :  { %v377_v49 = vadd.f32 %v376_v41, %v372_v31  ;;  %v383_v50 = vadd.f32 %v382_v42, %v373_v32  ;;  %755 = vmatpush.msra.mxu3 %v1217_v44  ;;  %798 = vmatpush.msrb.mxu1 %v1207_v48  ;;  %v1192_v31 = vld [vmem:[%s2413_s3 + $0x300] sm:$0xff]  ;;  %v1193_v32 = vld [vmem:[%s2413_s3 + $0x308] sm:$0xff]  ;;  %v1178_v41 = vld [vmem:[%s2413_s3 + $0x290] sm:$0xff] }
 0x16b   :  { %v392_v56 = vrot.slane %v391_v46, 1  ;;  %v398_v57 = vrot.slane %v397_v47, 1  ;;  %736 = vmatpush.msra.mxu2 %v1212_v51  ;;  %783 = vmatpush.msrb.mxu0 %v1186_v54  ;;  %v1179_v42 = vld [vmem:[%s2413_s3 + $0x298] sm:$0xff]  ;;  %v1184_v43 = vld [vmem:[%s2413_s3 + $0x2c0] sm:$0xff]  ;;  %v1185_v44 = vld [vmem:[%s2413_s3 + $0x2c8] sm:$0xff] }
 0x16c   :  { %v378_v59 = vrot.slane %v377_v49, 2  ;;  %v384_v60 = vrot.slane %v383_v50, 2  ;;  %756 = vmatpush.msra.mxu3 %v1213_v52  ;;  %799 = vmatpush.msrb.mxu1 %v1203_v58  ;;  %v1180_v48 = vld [vmem:[%s2413_s3 + $0x2a0] sm:$0xff]  ;;  %v1170_v52 = vld [vmem:[%s2413_s3 + $0x250] sm:$0xff]  ;;  %v1177_v58 = vld [vmem:[%s2413_s3 + $0x288] sm:$0xff] }
 0x16d   :  { %v393_v2 = vadd.f32 %v392_v56, %v391_v46  ;;  %v399_v5 = vadd.f32 %v398_v57, %v397_v47  ;;  %737 = vmatpush.msra.mxu2 %v1208_v63  ;;  %784 = vmatpush.msrb.mxu0 %v1182_v33  ;;  %v1175_v47 = vld [vmem:[%s2413_s3 + $0x278] sm:$0xff]  ;;  %v1176_v57 = vld [vmem:[%s2413_s3 + $0x280] sm:$0xff]  ;;  %v1161_v54 = vld [vmem:[%s2413_s3 + $0x208] sm:$0xff] }
 0x16e   :  { %v379_v7 = vadd.f32 %v378_v59, %v377_v49  ;;  %v385_v8 = vadd.f32 %v384_v60, %v383_v50  ;;  %757 = vmatpush.msra.mxu3 %v1209_v0  ;;  %800 = vmatpush.msrb.mxu1 %v1199_v6  ;;  %v1181_v49 = vld [vmem:[%s2413_s3 + $0x2a8] sm:$0xff]  ;;  %v1166_v60 = vld [vmem:[%s2413_s3 + $0x230] sm:$0xff]  ;;  %v1167_v63 = vld [vmem:[%s2413_s3 + $0x238] sm:$0xff] }
 0x16f   :  { %v402_v11 = vmul.f32 %v393_v2, %v1432_v38  ;;  %v403_v12 = vmul.f32 %v399_v5, %v1432_v38  ;;  %738 = vmatpush.msra.mxu2 %v1204_v61  ;;  %785 = vmatpush.msrb.mxu0 %v1178_v41  ;;  %v1173_v2 = vld [vmem:[%s2413_s3 + $0x268] sm:$0xff] }
 0x170   :  { %v380_v14 = vrot.slane %v379_v7, 1  ;;  %v386_v15 = vrot.slane %v385_v8, 1  ;;  %758 = vmatpush.msra.mxu3 %v1205_v62  ;;  %801 = vmatpush.msrb.mxu1 %v1195_v13  ;;  %v1168_v13 = vld [vmem:[%s2413_s3 + $0x240] sm:$0xff] }
 0x171   :  { %v1968_v21 = vadd.f32 0.8, %v402_v11  ;;  %v1970_v22 = vadd.f32 0.8, %v403_v12  ;;  %739 = vmatpush.msra.mxu2 %v1200_v16  ;;  %786 = vmatpush.msrb.mxu0 %v1174_v45 }
 0x172   :  { %v381_v25 = vadd.f32 %v380_v14, %v379_v7  ;;  %v387_v26 = vadd.f32 %v386_v15, %v385_v8  ;;  %759 = vmatpush.msra.mxu3 %v1201_v17  ;;  %802 = vmatpush.msrb.mxu1 %v1191_v23  ;;  %v1162_v7 = vld [vmem:[%s2413_s3 + $0x210] sm:$0xff]  ;;  %v1163_v8 = vld [vmem:[%s2413_s3 + $0x218] sm:$0xff]  ;;  %v1169_v14 = vld [vmem:[%s2413_s3 + $0x248] sm:$0xff] }
 0x173   :  { %1298 = vrsqrt.f32 %v1968_v21  ;;  %740 = vmatpush.msra.mxu2 %v1196_v10  ;;  %787 = vmatpush.msrb.mxu0 %v1170_v52  ;;  %v1164_v17 = vld [vmem:[%s2413_s3 + $0x220] sm:$0xff]  ;;  %vm444_vm11 = vweird.f32 %v1970_v22  ;;  %vm434_vm14 = vweird.f32 %v1968_v21 }
 0x174   :  { %1300 = vrsqrt.f32 %v1970_v22  ;;  %v400_v19 = vmul.f32 %v381_v25, %v1432_v38  ;;  %v401_v20 = vmul.f32 %v387_v26, %v1432_v38  ;;  %760 = vmatpush.msra.mxu3 %v1197_v29  ;;  %803 = vmatpush.msrb.mxu1 %v1187_v55  ;;  %v1160_v29 = vld [vmem:[%s2413_s3 + $0x200] sm:$0xff]  ;;  %s1147_s3 = sshll.u32 %s2417_s7, 4  ;;  %s1148_s3 = int_to_ptr.hbm [resolvable:$true] %s1147_s3 }
 0x175   :  { %741 = vmatpush.msra.mxu2 %v1192_v31  ;;  %788 = vmatpush.msrb.mxu0 %v1166_v60 }
 0x176   :  { %v2003_v35 = vadd.f32 0.8, %v400_v19  ;;  %v2005_v36 = vadd.f32 0.8, %v401_v20  ;;  %761 = vmatpush.msra.mxu3 %v1193_v32  ;;  %804 = vmatpush.msrb.mxu1 %v1183_v34 }
 0x177   :  { %742 = vmatpush.msra.mxu2 %v1188_v37  ;;  %789 = vmatpush.msrb.mxu0 %v1162_v7 }
 0x178   :  { %1302 = vrsqrt.f32 %v2003_v35  ;;  %762 = vmatpush.msra.mxu3 %v1189_v40  ;;  %805 = vmatpush.msrb.mxu1 %v1179_v42  ;;  %vm424_vm1 = vweird.f32 %v2005_v36  ;;  %vm414_vm4 = vweird.f32 %v2003_v35 }
 0x179   :  { %v2029_v46 = vpop.eup %1298  ;;  %1304 = vrsqrt.f32 %v2005_v36  ;;  %743 = vmatpush.msra.mxu2 %v1184_v43  ;;  %v482_v43 = vperm.slane %v1648_v30, 2 }
 0x17a   :  { %v2041_v50 = vpop.eup %1300  ;;  %v429_v51 = vmul.f32 %v2029_v46, %v1968_v21  ;;  %763 = vmatpush.msra.mxu3 %v1185_v44  ;;  %806 = vmatpush.msrb.mxu1 %v1175_v47  ;;  %vm435_vm12 = vweird.f32 %v2029_v46 }
 0x17b   :  { %v439_v56 = vmul.f32 %v2041_v50, %v1970_v22  ;;  %744 = vmatpush.msra.mxu2 %v1180_v48  ;;  %vm445_vm10 = vweird.f32 %v2041_v50  ;;  %vm436_vm15 = vmor %vm434_vm14, %vm435_vm12  ;;  %v490_v52 = vperm.slane %v482_v43, 2 }
 0x17c   :  { %v430_v59 = vmul.f32 %v2029_v46, %v429_v51  ;;  %764 = vmatpush.msra.mxu3 %v1181_v49  ;;  %807 = vmatpush.msrb.mxu1 %v1171_v53  ;;  %vm446_vm13 = vmor %vm444_vm11, %vm445_vm10 }
 0x17d   :  { %v440_v0 = vmul.f32 %v2041_v50, %v439_v56  ;;  %745 = vmatpush.msra.mxu2 %v1176_v57  ;;  %v481_v57 = vperm.slane %v1670_v39, 6 }
 0x17e   :  { %v2073_v5 = vpop.eup %1302  ;;  %v431_v6 = vmul.f32 0.5, %v430_v59  ;;  %765 = vmatpush.msra.mxu3 %v1177_v58  ;;  %808 = vmatpush.msrb.mxu1 %v1167_v63 }
 0x17f   :  { %v1305_v61 = vpop.eup %1304  ;;  %v441_v62 = vmul.f32 0.5, %v440_v0  ;;  %v409_v9 = vmul.f32 %v2073_v5, %v2003_v35  ;;  %746 = vmatpush.msra.mxu2 %v1172_v1  ;;  %vm415_vm2 = vweird.f32 %v2073_v5  ;;  %v1316_v35 = vld [vmem:[%s2412_s2] sm:$0x77] }
 0x180   :  { %v432_v11 = vsub.f32 1.5, %v431_v6  ;;  %v419_v12 = vmul.f32 %v1305_v61, %v2005_v36  ;;  %766 = vmatpush.msra.mxu3 %v1173_v2  ;;  %809 = vmatpush.msrb.mxu1 %v1163_v8  ;;  %vm425_vm0 = vweird.f32 %v1305_v61  ;;  %vm416_vm5 = vmor %vm414_vm4, %vm415_vm2  ;;  %v483_v36 = vperm.slane %v1648_v30, 6 }
 0x181   :  { %v442_v15 = vsub.f32 1.5, %v441_v62  ;;  %v410_v16 = vmul.f32 %v2073_v5, %v409_v9  ;;  %747 = vmatpush.msra.mxu2 %v1168_v13  ;;  %vm426_vm3 = vmor %vm424_vm1, %vm425_vm0  ;;  %v167_v49 = vperm.slane %v1316_v35, 6  ;;  %v489_v8 = vperm.slane %v481_v57, 2 }
 0x182   :  { %v420_v23 = vmul.f32 %v1305_v61, %v419_v12  ;;  %767 = vmatpush.msra.mxu3 %v1169_v14  ;;  %v433_v25 = vmul.f32 %v2029_v46, %v432_v11  ;;  %v491_v53 = vperm.slane %v483_v36, 2 }
 0x183   :  { %v443_v26 = vmul.f32 %v2041_v50, %v442_v15  ;;  %v411_v10 = vmul.f32 0.5, %v410_v16  ;;  %748 = vmatpush.msra.mxu2 %v1164_v17  ;;  %v171_v2 = vperm.slane %v167_v49, 2  ;;  %v1271_v49 = vld [vmem:[%s2415_s5 + $0x378] sm:$0xff] }
 0x184   :  { %v421_v22 = vmul.f32 0.5, %v420_v23  ;;  %768 = vmatpush.msra.mxu3 %v1165_v18  ;;  %v437_v32 = vsel %vm436_vm15, %v2029_v46, %v433_v25 }
 0x185   :  { %v447_v55 = vsel %vm446_vm13, %v2041_v50, %v443_v26  ;;  %v412_v19 = vsub.f32 1.5, %v411_v10  ;;  %749 = vmatpush.msra.mxu2 %v1160_v29 }
 0x186   :  { %v453_v20 = vrot.slane %v447_v55, 4  ;;  %v422_v31 = vsub.f32 1.5, %v421_v22  ;;  %769 = vmatpush.msra.mxu3 %v1161_v54 }
 0x187   :  { %v413_v34 = vmul.f32 %v2073_v5, %v412_v19 }
 0x188   :  { %v455_v33 = vsel %vm152_vm7, %v437_v32, %v453_v20  ;;  %v423_v21 = vmul.f32 %v1305_v61, %v422_v31  ;;  %v2144_v20 = vld [vmem:[%s2414_s4 + $0x10] sm:$0x77] }
 0x189   :  { %v457_v37 = vrot.slane %v455_v33, 7  ;;  %v417_v44 = vsel %vm416_vm5, %v2073_v5, %v413_v34 }
 0x18a   :  { %v427_v40 = vsel %vm426_vm3, %v1305_v61, %v423_v21 }
 0x18b   :  { %v461_v41 = vmul.f32 %v457_v37, %v1648_v30  ;;  %v452_v42 = vrot.slane %v427_v40, 4  ;;  %v480_v30 = vperm.slane %v1670_v39, 2  ;;  %v722_v37 = vperm.slane %v2144_v20, 0 }
 0x18c   :  { %v723_v40 = vperm.slane %v2144_v20, 4 }
 0x18d   :  { %v467_v45 = vperm.slane %v461_v41, 5  ;;  %v454_v46 = vsel %vm152_vm7, %v417_v44, %v452_v42  ;;  %v466_v47 = vperm.slane %v461_v41, 1  ;;  %v488_v7 = vperm.slane %v480_v30, 2 }
 0x18e   :  { %v456_v48 = vrot.slane %v454_v46, 7  ;;  %v730_v46 = vperm.slane %v722_v37, 0 }
 0x18f   :  { %v475_v50 = vperm.slane %v467_v45, 1  ;;  %v474_v51 = vperm.slane %v466_v47, 1  ;;  %v731_v47 = vperm.slane %v723_v40, 0 }
 0x190   :  { %v460_v56 = vmul.f32 %v456_v48, %v1670_v39 }
 0x191   :  { %v479_v58 = vmul.f32 %v475_v50, %v1831_v4  ;;  %v478_v59 = vmul.f32 %v474_v51, %v1828_v3  ;;  %v173_v3 = vadd.f32 %v171_v2, %v1630_v24  ;;  %v2137_v24 = vld [vmem:[%s2414_s4 + $0x18] sm:$0x77]  ;;  %v1269_v2 = vld [vmem:[%s2415_s5 + $0x368] sm:$0xff] }
 0x192   :  { %v465_v60 = vperm.slane %v460_v56, 5  ;;  %v464_v63 = vperm.slane %v460_v56, 1  ;;  %v724_v25 = vperm.slane %v2137_v24, 0  ;;  %v725_v26 = vperm.slane %v2137_v24, 4  ;;  %v1287_v50 = vld [vmem:[%s2415_s5 + $0x3f8] sm:$0xff] }
 0x193   :  { %v494_v0 = vadd.f32 %v490_v52, %v478_v59  ;;  %v495_v1 = vadd.f32 %v491_v53, %v479_v58  ;;  %v177_v16 = vmul.f32 0.2, %v173_v3  ;;  %vm175_vm11 = vcmp.ge.f32.partialorder %v173_v3, 0.0  ;;  %v1270_v58 = vld [vmem:[%s2415_s5 + $0x370] sm:$0xff] }
 0x194   :  { %v473_v5 = vperm.slane %v465_v60, 1  ;;  %v472_v6 = vperm.slane %v464_v63, 1  ;;  %v732_v10 = vperm.slane %v724_v25, 0  ;;  %v733_v29 = vperm.slane %v725_v26, 0  ;;  %v1286_v59 = vld [vmem:[%s2415_s5 + $0x3f0] sm:$0xff] }
 0x195   :  { %vm498_vm6 = vcmp.ge.f32.partialorder %v494_v0, 0.0  ;;  %v502_v61 = vmul.f32 0.2, %v494_v0  ;;  %vm499_vm8 = vcmp.ge.f32.partialorder %v495_v1, 0.0  ;;  %v503_v62 = vmul.f32 0.2, %v495_v1 }
 0x196   :  { %v477_v9 = vmul.f32 %v473_v5, %v1879_v28  ;;  %v476_v39 = vmul.f32 %v472_v6, %v1876_v27  ;;  %v179_v28 = vsel %vm175_vm11, %v173_v3, %v177_v16  ;;  %v1285_v5 = vld [vmem:[%s2415_s5 + $0x3e8] sm:$0xff] }
 0x197   :  { %v506_v4 = vsel %vm498_vm6, %v494_v0, %v502_v61  ;;  %v507_v11 = vsel %vm499_vm8, %v495_v1, %v503_v62  ;;  %v1268_v62 = vld [vmem:[%s2415_s5 + $0x360] sm:$0xff] }
 0x198   :  { %628 = vmatmul.f32.vlgmr.msra.gmra.mxu0 %v506_v4  ;;  %648 = vmatmul.f32.vlgmr.msra.gmra.mxu1 %v507_v11  ;;  %v492_v12 = vadd.f32 %v488_v7, %v476_v39  ;;  %v493_v13 = vadd.f32 %v489_v8, %v477_v9  ;;  %v1284_v9 = vld [vmem:[%s2415_s5 + $0x3e0] sm:$0xff] }
 0x199   :  { %1087 = vmatpush.msra.mxu0 %v1271_v49  ;;  %1107 = vmatpush.msra.mxu1 %v1287_v50 }
 0x19a   :  { %vm496_vm9 = vcmp.ge.f32.partialorder %v492_v12, 0.0  ;;  %v500_v14 = vmul.f32 0.2, %v492_v12  ;;  %vm497_vm10 = vcmp.ge.f32.partialorder %v493_v13, 0.0  ;;  %v501_v15 = vmul.f32 0.2, %v493_v13 }
 0x19b   :  { %1088 = vmatpush.msra.mxu0 %v1270_v58  ;;  %1108 = vmatpush.msra.mxu1 %v1286_v59 }
 0x19c   :  { %v504_v17 = vsel %vm496_vm9, %v492_v12, %v500_v14  ;;  %v505_v18 = vsel %vm497_vm10, %v493_v13, %v501_v15  ;;  %v1267_v12 = vld [vmem:[%s2415_s5 + $0x358] sm:$0xff] }
 0x19d   :  { %588 = vmatmul.f32.vlgmr.msrb.gmra.mxu2 %v504_v17  ;;  %608 = vmatmul.f32.vlgmr.msrb.gmra.mxu3 %v505_v18  ;;  %v1283_v13 = vld [vmem:[%s2415_s5 + $0x3d8] sm:$0xff]  ;;  %v1266_v18 = vld [vmem:[%s2415_s5 + $0x350] sm:$0xff] }
 0x19e   :  { %1089 = vmatpush.msra.mxu0 %v1269_v2  ;;  %1109 = vmatpush.msra.mxu1 %v1285_v5  ;;  %v1277_v5 = vld [vmem:[%s2415_s5 + $0x3a8] sm:$0xff] }
 0x1a0   :  { %790 = vmatmul.f32.vlgmr.msrb.gmra.mxu0 %v179_v28  ;;  %810 = vmatmul.f32.vlgmr.msrb.gmra.mxu1 %v179_v28 }
 0x1a1   :  { %1090 = vmatpush.msra.mxu0 %v1268_v62  ;;  %1110 = vmatpush.msra.mxu1 %v1284_v9  ;;  %v1260_v62 = vld [vmem:[%s2415_s5 + $0x320] sm:$0xff] }
 0x1a3   :  { %1091 = vmatpush.msra.mxu0 %v1267_v12  ;;  %1111 = vmatpush.msra.mxu1 %v1283_v13 }
 0x1a5   :  { %750 = vmatmul.f32.vlgmr.msra.gmra.mxu2 %v179_v28  ;;  %770 = vmatmul.f32.vlgmr.msra.gmra.mxu3 %v179_v28  ;;  %v1282_v28 = vld [vmem:[%s2415_s5 + $0x3d0] sm:$0xff] }
 0x1a6   :  { %1092 = vmatpush.msra.mxu0 %v1266_v18  ;;  %1112 = vmatpush.msra.mxu1 %v1282_v28  ;;  %v1275_v28 = vld [vmem:[%s2415_s5 + $0x398] sm:$0xff] }
 0x215   :  { %v629_v27 = vpop.f32.mrf.mxu0  ;;  %v649_v23 = vpop.f32.mrf.mxu1 }
 0x21d   :  { %v791_v54 = vpop.f32.mrf.mxu0  ;;  %v811_v22 = vpop.f32.mrf.mxu1 }
 0x21e   :  { %v792_v55 = vadd.f32 %v791_v54, %v732_v10  ;;  %v812_v19 = vadd.f32 %v811_v22, %v733_v29  ;;  %v1239_v10 = vld [vmem:[%s2415_s5 + $0x278] sm:$0xff]  ;;  %v1265_v54 = vld [vmem:[%s2415_s5 + $0x348] sm:$0xff] }
 0x21f   :  { %v1255_v29 = vld [vmem:[%s2415_s5 + $0x2f8] sm:$0xff]  ;;  %1047 = vmatpush.msrb.mxu2 %v1239_v10  ;;  %1093 = vmatpush.msra.mxu0 %v1265_v54  ;;  %v1258_v10 = vld [vmem:[%s2415_s5 + $0x310] sm:$0xff] }
 0x220   :  { %v826_v31 = vrot.slane %v792_v55, 4  ;;  %v832_v32 = vrot.slane %v812_v19, 4  ;;  %v589_v33 = vpop.f32.mrf.mxu2  ;;  %v609_v34 = vpop.f32.mrf.mxu3  ;;  %1067 = vmatpush.msrb.mxu3 %v1255_v29  ;;  %v1274_v29 = vld [vmem:[%s2415_s5 + $0x390] sm:$0xff] }
 0x221   :  { %v610_v21 = vadd.f32 %v609_v34, %v589_v33  ;;  %v1238_v33 = vld [vmem:[%s2415_s5 + $0x270] sm:$0xff] }
 0x222   :  { %v827_v41 = vadd.f32 %v826_v31, %v792_v55  ;;  %v833_v42 = vadd.f32 %v832_v32, %v812_v19  ;;  %v1254_v34 = vld [vmem:[%s2415_s5 + $0x2f0] sm:$0xff]  ;;  %1048 = vmatpush.msrb.mxu2 %v1238_v33 }
 0x223   :  { %v630_v43 = vadd.f32 %v629_v27, %v610_v21  ;;  %v1264_v21 = vld [vmem:[%s2415_s5 + $0x340] sm:$0xff]  ;;  %1068 = vmatpush.msrb.mxu3 %v1254_v34 }
 0x224   :  { %v828_v36 = vrot.slane %v827_v41, 2  ;;  %v834_v44 = vrot.slane %v833_v42, 2  ;;  %1094 = vmatpush.msra.mxu0 %v1264_v21  ;;  %v1230_v21 = vld [vmem:[%s2415_s5 + $0x230] sm:$0xff] }
 0x225   :  { %v2148_v45 = vadd.f32 %v649_v23, %v630_v43 }
 0x226   :  { %v829_v48 = vadd.f32 %v828_v36, %v827_v41  ;;  %v835_v35 = vadd.f32 %v834_v44, %v833_v42  ;;  %v1280_v41 = vld [vmem:[%s2415_s5 + $0x3c0] sm:$0xff]  ;;  %v1237_v36 = vld [vmem:[%s2415_s5 + $0x268] sm:$0xff] }
 0x227   :  { %v1253_v44 = vld [vmem:[%s2415_s5 + $0x2e8] sm:$0xff]  ;;  %1049 = vmatpush.msrb.mxu2 %v1237_v36 }
 0x228   :  { %v830_v51 = vrot.slane %v829_v48, 1  ;;  %v836_v52 = vrot.slane %v835_v35, 1  ;;  %v751_v53 = vpop.f32.mrf.mxu2  ;;  %v771_v56 = vpop.f32.mrf.mxu3  ;;  %1069 = vmatpush.msrb.mxu3 %v1253_v44  ;;  %v1229_v36 = vld [vmem:[%s2415_s5 + $0x228] sm:$0xff] }
 0x229   :  { %v2156_v30 = vadd.f32 %v751_v53, %v730_v46  ;;  %v2158_v57 = vadd.f32 %v771_v56, %v731_v47  ;;  %v1263_v46 = vld [vmem:[%s2415_s5 + $0x338] sm:$0xff]  ;;  %v1262_v53 = vld [vmem:[%s2415_s5 + $0x330] sm:$0xff]  ;;  %v1245_v44 = vld [vmem:[%s2415_s5 + $0x2a8] sm:$0xff] }
 0x22a   :  { %v831_v60 = vadd.f32 %v830_v51, %v829_v48  ;;  %v837_v63 = vadd.f32 %v836_v52, %v835_v35  ;;  %v1279_v35 = vld [vmem:[%s2415_s5 + $0x3b8] sm:$0xff]  ;;  %1095 = vmatpush.msra.mxu0 %v1263_v46  ;;  %v1236_v51 = vld [vmem:[%s2415_s5 + $0x260] sm:$0xff] }
 0x22b   :  { %v814_v0 = vrot.slane %v2156_v30, 4  ;;  %v820_v1 = vrot.slane %v2158_v57, 4  ;;  %v1252_v52 = vld [vmem:[%s2415_s5 + $0x2e0] sm:$0xff]  ;;  %1050 = vmatpush.msrb.mxu2 %v1236_v51 }
 0x22c   :  { %v840_v6 = vmul.f32 %v831_v60, %v1432_v38  ;;  %v841_v7 = vmul.f32 %v837_v63, %v1432_v38  ;;  %1070 = vmatpush.msrb.mxu3 %v1252_v52  ;;  %1096 = vmatpush.msra.mxu0 %v1262_v53  ;;  %v1235_v60 = vld [vmem:[%s2415_s5 + $0x258] sm:$0xff]  ;;  %v1228_v52 = vld [vmem:[%s2415_s5 + $0x220] sm:$0xff] }
 0x22d   :  { %v815_v8 = vadd.f32 %v814_v0, %v2156_v30  ;;  %v821_v61 = vadd.f32 %v820_v1, %v2158_v57  ;;  %v1251_v63 = vld [vmem:[%s2415_s5 + $0x2d8] sm:$0xff]  ;;  %v1261_v0 = vld [vmem:[%s2415_s5 + $0x328] sm:$0xff]  ;;  %1051 = vmatpush.msrb.mxu2 %v1235_v60  ;;  %v1244_v53 = vld [vmem:[%s2415_s5 + $0x2a0] sm:$0xff] }
 0x22e   :  { %v2184_v39 = vsub.f32 %v792_v55, %v840_v6  ;;  %v2186_v4 = vsub.f32 %v812_v19, %v841_v7  ;;  %v1281_v19 = vld [vmem:[%s2415_s5 + $0x3c8] sm:$0xff]  ;;  %1071 = vmatpush.msrb.mxu3 %v1251_v63  ;;  %1097 = vmatpush.msra.mxu0 %v1261_v0  ;;  %v1226_v63 = vld [vmem:[%s2415_s5 + $0x210] sm:$0xff] }
 0x22f   :  { %v816_v11 = vrot.slane %v815_v8, 2  ;;  %v822_v3 = vrot.slane %v821_v61, 2  ;;  %1113 = vmatpush.msra.mxu1 %v1281_v19  ;;  %v1247_v19 = vld [vmem:[%s2415_s5 + $0x2b8] sm:$0xff]  ;;  %v1242_v0 = vld [vmem:[%s2415_s5 + $0x290] sm:$0xff] }
 0x230   :  { %v848_v14 = vmul.f32 %v2184_v39, %v2184_v39  ;;  %v849_v15 = vmul.f32 %v2186_v4, %v2186_v4  ;;  %1098 = vmatpush.msra.mxu0 %v1260_v62 }
 0x231   :  { %v817_v16 = vadd.f32 %v816_v11, %v815_v8  ;;  %v823_v17 = vadd.f32 %v822_v3, %v821_v61  ;;  %1114 = vmatpush.msra.mxu1 %v1280_v41  ;;  %v1234_v8 = vld [vmem:[%s2415_s5 + $0x250] sm:$0xff]  ;;  %v1276_v3 = vld [vmem:[%s2415_s5 + $0x3a0] sm:$0xff] }
 0x232   :  { %v862_v27 = vrot.slane %v848_v14, 4  ;;  %v868_v23 = vrot.slane %v849_v15, 4  ;;  %v1250_v61 = vld [vmem:[%s2415_s5 + $0x2d0] sm:$0xff]  ;;  %1052 = vmatpush.msrb.mxu2 %v1234_v8  ;;  %v1272_v41 = vld [vmem:[%s2415_s5 + $0x380] sm:$0xff] }
 0x233   :  { %v818_v25 = vrot.slane %v817_v16, 1  ;;  %v824_v26 = vrot.slane %v823_v17, 1  ;;  %1115 = vmatpush.msra.mxu1 %v1279_v35  ;;  %1072 = vmatpush.msrb.mxu3 %v1250_v61  ;;  %v1224_v8 = vld [vmem:[%s2415_s5 + $0x200] sm:$0xff] }
 0x234   :  { %v863_v22 = vadd.f32 %v862_v27, %v848_v14  ;;  %v869_v55 = vadd.f32 %v868_v23, %v849_v15  ;;  %v1233_v14 = vld [vmem:[%s2415_s5 + $0x248] sm:$0xff]  ;;  %v1240_v61 = vld [vmem:[%s2415_s5 + $0x280] sm:$0xff] }
 0x235   :  { %v819_v31 = vadd.f32 %v818_v25, %v817_v16  ;;  %v825_v32 = vadd.f32 %v824_v26, %v823_v17  ;;  %v1249_v15 = vld [vmem:[%s2415_s5 + $0x2c8] sm:$0xff]  ;;  %v1259_v16 = vld [vmem:[%s2415_s5 + $0x318] sm:$0xff]  ;;  %1053 = vmatpush.msrb.mxu2 %v1233_v14  ;;  %v1232_v25 = vld [vmem:[%s2415_s5 + $0x240] sm:$0xff] }
 0x236   :  { %v864_v37 = vrot.slane %v863_v22, 2  ;;  %v870_v40 = vrot.slane %v869_v55, 2  ;;  %1073 = vmatpush.msrb.mxu3 %v1249_v15  ;;  %1099 = vmatpush.msra.mxu0 %v1259_v16  ;;  %v1248_v26 = vld [vmem:[%s2415_s5 + $0x2c0] sm:$0xff] }
 0x237   :  { %v838_v42 = vmul.f32 %v819_v31, %v1432_v38  ;;  %v839_v43 = vmul.f32 %v825_v32, %v1432_v38  ;;  %1054 = vmatpush.msrb.mxu2 %v1232_v25  ;;  %v1257_v31 = vld [vmem:[%s2415_s5 + $0x308] sm:$0xff] }
 0x238   :  { %v865_v47 = vadd.f32 %v864_v37, %v863_v22  ;;  %v871_v48 = vadd.f32 %v870_v40, %v869_v55  ;;  %1074 = vmatpush.msrb.mxu3 %v1248_v26  ;;  %1100 = vmatpush.msra.mxu0 %v1258_v10  ;;  %v1231_v55 = vld [vmem:[%s2415_s5 + $0x238] sm:$0xff]  ;;  %v1273_v32 = vld [vmem:[%s2415_s5 + $0x388] sm:$0xff]  ;;  %v1246_v37 = vld [vmem:[%s2415_s5 + $0x2b0] sm:$0xff] }
 0x239   :  { %v2243_v49 = vsub.f32 %v2156_v30, %v838_v42  ;;  %v2246_v50 = vsub.f32 %v2158_v57, %v839_v43  ;;  %v1278_v57 = vld [vmem:[%s2415_s5 + $0x3b0] sm:$0xff]  ;;  %1055 = vmatpush.msrb.mxu2 %v1231_v55  ;;  %v1256_v40 = vld [vmem:[%s2415_s5 + $0x300] sm:$0xff] }
 0x23a   :  { %v866_v56 = vrot.slane %v865_v47, 1  ;;  %v872_v30 = vrot.slane %v871_v48, 1  ;;  %1116 = vmatpush.msra.mxu1 %v1278_v57  ;;  %1075 = vmatpush.msrb.mxu3 %v1247_v19 }
 0x23b   :  { %v846_v58 = vmul.f32 %v2243_v49, %v2243_v49  ;;  %v847_v59 = vmul.f32 %v2246_v50, %v2246_v50  ;;  %1101 = vmatpush.msra.mxu0 %v1257_v31  ;;  %1056 = vmatpush.msrb.mxu2 %v1230_v21 }
 0x23c   :  { %v867_v1 = vadd.f32 %v866_v56, %v865_v47  ;;  %v873_v2 = vadd.f32 %v872_v30, %v871_v48  ;;  %1117 = vmatpush.msra.mxu1 %v1277_v5  ;;  %1076 = vmatpush.msrb.mxu3 %v1246_v37  ;;  %v1241_v5 = vld [vmem:[%s2415_s5 + $0x288] sm:$0xff] }
 0x23d   :  { %v850_v6 = vrot.slane %v846_v58, 4  ;;  %v856_v7 = vrot.slane %v847_v59, 4  ;;  %1102 = vmatpush.msra.mxu0 %v1256_v40  ;;  %1057 = vmatpush.msrb.mxu2 %v1229_v36 }
 0x23e   :  { %v876_v9 = vmul.f32 %v867_v1, %v1432_v38  ;;  %v877_v11 = vmul.f32 %v873_v2, %v1432_v38  ;;  %1118 = vmatpush.msra.mxu1 %v1276_v3  ;;  %1077 = vmatpush.msrb.mxu3 %v1245_v44  ;;  %v1225_v2 = vld [vmem:[%s2415_s5 + $0x208] sm:$0xff] }
 0x23f   :  { %v851_v12 = vadd.f32 %v850_v6, %v846_v58  ;;  %v857_v13 = vadd.f32 %v856_v7, %v847_v59  ;;  %1058 = vmatpush.msrb.mxu2 %v1228_v52  ;;  %v1243_v59 = vld [vmem:[%s2415_s5 + $0x298] sm:$0xff] }
 0x240   :  { %v2299_v17 = vadd.f32 0.8, %v876_v9  ;;  %v2301_v18 = vadd.f32 0.8, %v877_v11  ;;  %1119 = vmatpush.msra.mxu1 %v1275_v28  ;;  %1078 = vmatpush.msrb.mxu3 %v1244_v53  ;;  %v954_v53 = vperm.slane %v2144_v20, 2 }
 0x241   :  { %v852_v27 = vrot.slane %v851_v12, 2  ;;  %v858_v23 = vrot.slane %v857_v13, 2 }
 0x242   :  { %1306 = vrsqrt.f32 %v2299_v17  ;;  %1120 = vmatpush.msra.mxu1 %v1274_v29  ;;  %1079 = vmatpush.msrb.mxu3 %v1243_v59  ;;  %vm918_vm14 = vweird.f32 %v2301_v18  ;;  %vm908_vm0 = vweird.f32 %v2299_v17  ;;  %v962_v59 = vperm.slane %v954_v53, 2 }
 0x243   :  { %1308 = vrsqrt.f32 %v2301_v18  ;;  %v853_v54 = vadd.f32 %v852_v27, %v851_v12  ;;  %v859_v22 = vadd.f32 %v858_v23, %v857_v13 }
 0x244   :  { %1121 = vmatpush.msra.mxu1 %v1273_v32  ;;  %1080 = vmatpush.msrb.mxu3 %v1242_v0 }
 0x245   :  { %v854_v33 = vrot.slane %v853_v54, 1  ;;  %v860_v34 = vrot.slane %v859_v22, 1 }
 0x246   :  { %1122 = vmatpush.msra.mxu1 %v1272_v41  ;;  %1081 = vmatpush.msrb.mxu3 %v1241_v5 }
 0x247   :  { %v855_v42 = vadd.f32 %v854_v33, %v853_v54  ;;  %v861_v43 = vadd.f32 %v860_v34, %v859_v22  ;;  %v956_v22 = vperm.slane %v2137_v24, 2 }
 0x248   :  { %v1307_v46 = vpop.eup %1306  ;;  %1082 = vmatpush.msrb.mxu3 %v1240_v61 }
 0x249   :  { %v1309_v47 = vpop.eup %1308  ;;  %v903_v48 = vmul.f32 %v1307_v46, %v2299_v17  ;;  %v874_v35 = vmul.f32 %v855_v42, %v1432_v38  ;;  %v875_v51 = vmul.f32 %v861_v43, %v1432_v38  ;;  %v1227_v38 = vld [vmem:[%s2415_s5 + $0x218] sm:$0xff]  ;;  %vm909_vm13 = vweird.f32 %v1307_v46  ;;  %s1344_s5 = smov 64  }
 0x24a   :  { %v913_v56 = vmul.f32 %v1309_v47, %v2301_v18  ;;  %1059 = vmatpush.msrb.mxu2 %v1227_v38  ;;  %vm919_vm12 = vweird.f32 %v1309_v47  ;;  %vm910_vm1 = vmor %vm908_vm0, %vm909_vm13  ;;  %v957_v17 = vperm.slane %v2137_v24, 6  ;;  %v964_v37 = vperm.slane %v956_v22, 2 }
 0x24b   :  { %v904_v30 = vmul.f32 %v1307_v46, %v903_v48  ;;  %v2360_v57 = vadd.f32 0.8, %v874_v35  ;;  %v879_v58 = vadd.f32 0.8, %v875_v51  ;;  %vm920_vm15 = vmor %vm918_vm14, %vm919_vm12  ;;  %vm1131_vm12 = vcmask 523264  }
 0x24c   :  { %v914_v60 = vmul.f32 %v1309_v47, %v913_v56  ;;  %1060 = vmatpush.msrb.mxu2 %v1226_v63  ;;  %v965_v40 = vperm.slane %v957_v17, 2 }
 0x24d   :  { %v905_v1 = vmul.f32 0.5, %v904_v30  ;;  %1310 = vrsqrt.f32 %v2360_v57  ;;  %vm898_vm4 = vweird.f32 %v879_v58  ;;  %vm888_vm6 = vweird.f32 %v2360_v57 }
 0x24e   :  { %v915_v6 = vmul.f32 0.5, %v914_v60  ;;  %1312 = vrsqrt.f32 %v879_v58  ;;  %1061 = vmatpush.msrb.mxu2 %v1225_v2 }
 0x24f   :  { %v906_v7 = vsub.f32 1.5, %v905_v1 }
 0x250   :  { %v916_v62 = vsub.f32 1.5, %v915_v6  ;;  %1062 = vmatpush.msrb.mxu2 %v1224_v8 }
 0x251   :  { %v907_v9 = vmul.f32 %v1307_v46, %v906_v7 }
 0x252   :  { %v917_v11 = vmul.f32 %v1309_v47, %v916_v62 }
 0x253   :  { %v1311_v3 = vpop.eup %1310  ;;  %v911_v28 = vsel %vm910_vm1, %v1307_v46, %v907_v9 }
 0x254   :  { %v1313_v12 = vpop.eup %1312  ;;  %v921_v13 = vsel %vm920_vm15, %v1309_v47, %v917_v11  ;;  %v883_v14 = vmul.f32 %v1311_v3, %v2360_v57  ;;  %vm889_vm3 = vweird.f32 %v1311_v3 }
 0x255   :  { %v927_v15 = vrot.slane %v921_v13, 4  ;;  %v893_v16 = vmul.f32 %v1313_v12, %v879_v58  ;;  %vm899_vm2 = vweird.f32 %v1313_v12  ;;  %vm890_vm8 = vmor %vm888_vm6, %vm889_vm3 }
 0x256   :  { %v884_v27 = vmul.f32 %v1311_v3, %v883_v14  ;;  %vm900_vm5 = vmor %vm898_vm4, %vm899_vm2 }
 0x257   :  { %v929_v23 = vsel %vm152_vm7, %v911_v28, %v927_v15  ;;  %v894_v25 = vmul.f32 %v1313_v12, %v893_v16 }
 0x258   :  { %v931_v26 = vrot.slane %v929_v23, 7  ;;  %v885_v18 = vmul.f32 0.5, %v884_v27 }
 0x259   :  { %v895_v10 = vmul.f32 0.5, %v894_v25 }
 0x25a   :  { %v935_v29 = vmul.f32 %v2137_v24, %v931_v26  ;;  %v886_v54 = vsub.f32 1.5, %v885_v18 }
 0x25b   :  { %v896_v55 = vsub.f32 1.5, %v895_v10 }
 0x25c   :  { %v941_v19 = vperm.slane %v935_v29, 5  ;;  %v940_v31 = vperm.slane %v935_v29, 1  ;;  %v887_v32 = vmul.f32 %v1311_v3, %v886_v54 }
 0x25d   :  { %v897_v33 = vmul.f32 %v1313_v12, %v896_v55 }
 0x25e   :  { %v949_v34 = vperm.slane %v941_v19, 1  ;;  %v948_v21 = vperm.slane %v940_v31, 1  ;;  %v891_v36 = vsel %vm890_vm8, %v1311_v3, %v887_v32 }
 0x25f   :  { %v901_v41 = vsel %vm900_vm5, %v1313_v12, %v897_v33 }
 0x260   :  { %v953_v42 = vmul.f32 %v949_v34, %v2186_v4  ;;  %v926_v24 = vrot.slane %v901_v41, 4  ;;  %v952_v43 = vmul.f32 %v948_v21, %v2184_v39  ;;  %v955_v4 = vperm.slane %v2144_v20, 6 }
 0x262   :  { %v928_v44 = vsel %vm152_vm7, %v891_v36, %v926_v24  ;;  %v968_v46 = vadd.f32 %v964_v37, %v952_v43  ;;  %v969_v47 = vadd.f32 %v965_v40, %v953_v42  ;;  %v963_v60 = vperm.slane %v955_v4, 2 }
 0x263   :  { %v930_v48 = vrot.slane %v928_v44, 7 }
 0x264   :  { %vm972_vm9 = vcmp.ge.f32.partialorder %v968_v46, 0.0  ;;  %v976_v35 = vmul.f32 0.2, %v968_v46  ;;  %vm973_vm10 = vcmp.ge.f32.partialorder %v969_v47, 0.0  ;;  %v977_v51 = vmul.f32 0.2, %v969_v47 }
 0x265   :  { %v934_v52 = vmul.f32 %v2144_v20, %v930_v48 }
 0x266   :  { %v980_v56 = vsel %vm972_vm9, %v968_v46, %v976_v35  ;;  %v981_v30 = vsel %vm973_vm10, %v969_v47, %v977_v51 }
 0x267   :  { %v939_v57 = vperm.slane %v934_v52, 5  ;;  %1103 = vmatmul.f32.vlgmr.msra.gmra.mxu0 %v980_v56  ;;  %1123 = vmatmul.f32.vlgmr.msra.gmra.mxu1 %v981_v30  ;;  %v938_v39 = vperm.slane %v934_v52, 1 }
 0x269   :  { %v947_v58 = vperm.slane %v939_v57, 1  ;;  %v946_v38 = vperm.slane %v938_v39, 1 }
 0x26b   :  { %v951_v63 = vmul.f32 %v947_v58, %v2246_v50  ;;  %v950_v0 = vmul.f32 %v946_v38, %v2243_v49  ;;  %v1291_v49 = vld [vmem:[%s2416_s6] ss:$0 sm:$0xff] }
 0x26d   :  { %v966_v1 = vadd.f32 %v962_v59, %v950_v0  ;;  %v967_v2 = vadd.f32 %v963_v60, %v951_v63 }
 0x26f   :  { %vm970_vm7 = vcmp.ge.f32.partialorder %v966_v1, 0.0  ;;  %v974_v5 = vmul.f32 0.2, %v966_v1  ;;  %vm971_vm11 = vcmp.ge.f32.partialorder %v967_v2, 0.0  ;;  %v975_v20 = vmul.f32 0.2, %v967_v2 }
 0x271   :  { %v978_v6 = vsel %vm970_vm7, %v966_v1, %v974_v5  ;;  %v979_v7 = vsel %vm971_vm11, %v967_v2, %v975_v20 }
 0x272   :  { %1063 = vmatmul.f32.vlgmr.msrb.gmra.mxu2 %v978_v6  ;;  %1083 = vmatmul.f32.vlgmr.msrb.gmra.mxu3 %v979_v7 }
 0x2e4   :  { %v1104_v9 = vpop.f32.mrf.mxu0  ;;  %v1124_v3 = vpop.f32.mrf.mxu1 }
 0x2f5   :  { %v1064_v8 = vpop.f32.mrf.mxu2  ;;  %v1084_v61 = vpop.f32.mrf.mxu3 }
 0x2f6   :  { %v1085_v62 = vadd.f32 %v1084_v61, %v1064_v8 }
 0x2f8   :  { %v1105_v11 = vadd.f32 %v1104_v9, %v1085_v62 }
 0x2fa   :  { %v1125_v12 = vadd.f32 %v1124_v3, %v1105_v11 }
 0x2fc   :  { %1128 = vrot.lane.b32.xlu0 %v1125_v12, %s1344_s5 }
 0x36e   :  { %v1129_v50 = vpop.permute.xlu0 %1128 }
 0x36f   :  { %v1132_v13 = vsel %vm1131_vm12, %v2148_v45, %v1129_v50 }
 0x370   :  { %v1137_v14 = vadd.f32 %v1291_v49, %v1132_v13 }
 0x372   :  { %1314 = vtanh.f32 %v1137_v14 }
 0x378   :  { %v1315_v15 = vpop.eup %1314 }
 0x379   :  { %1139 = vst [vmem:[#allocation2] sm:$0xff] %v1315_v15 }
 0x37a   :  { %1150 = dma.vmem_to_hbm [thread:$0]  %s1146_s29, 128, %s1148_s3, [#allocation3]  }
 0x37b   :  { %1341 = dma.done.wait [#allocation3], 128  }
 0x37c   :  { %1342 = vsyncadd [#allocation3], 4294967168 }
 0x37d   :  { %1155 = vsyncpa [#allocation3], 1 }

</bundles_post_ra>
